<compile_context>
chip_gen: v5e
topology: v5e:2x2
jax: 0.10.0
libtpu: 0.0.40
codegen_flags: <defaults>
</compile_context>

<pallas_src>
import functools

import jax
import jax.numpy as jnp
from jax.experimental import pallas as pl
from jax.experimental.pallas import tpu as pltpu

_BF16 = jnp.bfloat16


# ---------------------------------------------------------------------------
# Generation-aware VMEM budgeting / tiling helpers
# ---------------------------------------------------------------------------
@functools.lru_cache(maxsize=None)
def _vmem_limit_bytes():
    """~3/4 of physical VMEM: ~96 MiB on v5e/v6e (128 MiB), ~48 MiB on v7x (64 MiB)."""
    try:
        cap = int(pltpu.get_tpu_info().vmem_capacity_bytes)
    except Exception:
        cap = 64 * 1024 * 1024  # v7x-safe fallback
    return (cap * 3) // 4


def _invariant_spec(block_shape, index_map):
    """Grid-invariant block: single-buffered (no pointless double-buffering)."""
    try:
        return pl.BlockSpec(block_shape, index_map, pipeline_mode=pl.Buffered(1))
    except TypeError:  # older BlockSpec signature without pipeline_mode
        return pl.BlockSpec(block_shape, index_map)


def _pick_tile_nodes(n, max_cols=8192):
    """Node (lane) tile for projection / embedding grids; >=2 steps for megacore."""
    if n < 256:
        return n
    half = -(-n // 2)
    t = ((half + 127) // 128) * 128
    return min(max_cols, t, n)


def _pick_tile_dst(n, hd_dim, num_heads, budget):
    """Destination-column tile for aggregation.

    Largest multiple of 128 whose working set (int8 adj x2 buffers, ~3 live f32
    (n, tile) temporaries, tiled f32 blocks) plus the single-buffered residents
    (bf16 feat_T, f32 sc_l) fits the generation-aware VMEM budget, keeping >=2
    grid steps when possible so v7x can shard across both TensorCores.
    """
    resident = 2 * hd_dim * n + 4 * num_heads * n + (256 << 10)
    per_col = 18 * n + 16 * hd_dim + 16 * num_heads + 64
    avail = budget - resident
    t = avail // per_col if avail > 0 else 0
    if t >= n:
        if n >= 256:
            t = ((-(-n // 2) + 127) // 128) * 128
            return min(t, n)
        return n
    return min(n, max(128, (t // 128) * 128))


# ---------------------------------------------------------------------------
# Pallas kernels
# ---------------------------------------------------------------------------
def _embed_kernel(x_ref, w_ref, b_ref, o_ref):
    """h_T = W^T @ x^T + b  (feature-major output, lane-dense over nodes)."""
    o_ref[...] = jax.lax.dot_general(
        w_ref[...], x_ref[...].astype(_BF16),
        dimension_numbers=(((0,), (1,)), ((), ())),
        preferred_element_type=jnp.float32) + b_ref[...]


def embed(x, w_bf, b_col):
    n, din = x.shape
    hd_dim = w_bf.shape[1]
    limit = _vmem_limit_bytes()
    tile = _pick_tile_nodes(n)
    return pl.pallas_call(
        _embed_kernel,
        out_shape=jax.ShapeDtypeStruct((hd_dim, n), jnp.float32),
        grid=(pl.cdiv(n, tile),),
        in_specs=[
            pl.BlockSpec((tile, din), lambda i: (i, 0)),
            _invariant_spec((din, hd_dim), lambda i: (0, 0)),
            _invariant_spec((hd_dim, 1), lambda i: (0, 0)),
        ],
        out_specs=pl.BlockSpec((hd_dim, tile), lambda i: (0, i)),
        compiler_params=pltpu.CompilerParams(
            dimension_semantics=("parallel",),
            vmem_limit_bytes=limit,
        ),
    )(x, w_bf, b_col)


def _project_kernel(h_t_ref, w_aug_t_ref, wa_l_ref, feat_t_ref, sct_ref, scl_ref,
                    *, hd_dim):
    """[feat_T ; scores_T] = W_aug^T @ h_T  (one lane-dense MXU dot) + src-score cols."""
    h_bf = h_t_ref[...].astype(_BF16)                                   # (din, T)
    stacked = jnp.dot(w_aug_t_ref[...], h_bf,
                      preferred_element_type=jnp.float32)               # (HD+2H, T)
    feat_t_ref[...] = stacked[:hd_dim, :].astype(_BF16)                 # bf16 feat_T
    sct_ref[...] = stacked[hd_dim:, :]                                  # f32 scores_T
    # source-side a_l scores as node-major columns (T, H) — tiny dot
    scl_ref[...] = jax.lax.dot_general(
        h_bf, wa_l_ref[...],
        dimension_numbers=(((0,), (0,)), ((), ())),
        preferred_element_type=jnp.float32)


def project(h_t, w_aug_t_bf, wa_l_bf, *, hd_dim):
    din, n = h_t.shape
    aug = w_aug_t_bf.shape[0]            # HD + 2H
    two_h = aug - hd_dim
    nh = wa_l_bf.shape[1]
    limit = _vmem_limit_bytes()
    tile = _pick_tile_nodes(n)
    kernel = functools.partial(_project_kernel, hd_dim=hd_dim)
    return pl.pallas_call(
        kernel,
        out_shape=(
            jax.ShapeDtypeStruct((hd_dim, n), _BF16),        # feat_T (bf16)
            jax.ShapeDtypeStruct((two_h, n), jnp.float32),   # scores_T (f32, softmax path)
            jax.ShapeDtypeStruct((n, nh), jnp.float32),      # src-score columns
        ),
        grid=(pl.cdiv(n, tile),),
        in_specs=[
            pl.BlockSpec((din, tile), lambda i: (0, i)),
            _invariant_spec((aug, din), lambda i: (0, 0)),
            _invariant_spec((din, nh), lambda i: (0, 0)),
        ],
        out_specs=(
            pl.BlockSpec((hd_dim, tile), lambda i: (0, i)),
            pl.BlockSpec((two_h, tile), lambda i: (0, i)),
            pl.BlockSpec((tile, nh), lambda i: (i, 0)),
        ),
        compiler_params=pltpu.CompilerParams(
            dimension_semantics=("parallel",),
            vmem_limit_bytes=limit,
        ),
    )(h_t, w_aug_t_bf, wa_l_bf)


def _gat_agg_kernel(adj_ref, feat_t_ref, sct_ref, scl_ref, *refs,
                    num_heads, out_dim, residual):
    if residual:
        h_ref, b_ref, o_ref = refs
    else:
        b_ref, o_ref = refs

    mask = adj_ref[...] != 0                               # (N_src, T_dst), no f32 widen

    outs = []
    for hd in range(num_heads):
        el = scl_ref[:, hd:hd + 1]                         # (N, 1)  a_l . f_src
        er = sct_ref[num_heads + hd:num_heads + hd + 1, :] # (1, T)  a_r . f_dst
        e = el + er                                        # (N, T)  f32
        e = jnp.where(e > 0.0, e, 0.2 * e)                 # LeakyReLU(0.2)
        e = jnp.where(mask, e, -1e30)                      # mask non-edges
        m = jnp.max(e, axis=0, keepdims=True)              # softmax over src (sublanes)
        p = jnp.exp(e - m)                                 # masked entries underflow to 0
        denom = jnp.maximum(jnp.sum(p, axis=0, keepdims=True), 1e-9)
        num = jnp.dot(feat_t_ref[hd * out_dim:(hd + 1) * out_dim, :],
                      p.astype(_BF16),
                      preferred_element_type=jnp.float32)  # (D, T) — full-lane MXU output
        outs.append(num * pl.reciprocal(denom, approx=True))  # EUP reciprocal

    out = outs[0] if num_heads == 1 else jnp.concatenate(outs, axis=0)   # (HD, T)
    out = out + b_ref[...]                                               # GATConv bias
    out = jnp.where(out > 0.0, out, jnp.exp(jnp.minimum(out, 0.0)) - 1.0)  # ELU
    if residual:
        out = out + h_ref[...]
    o_ref[...] = out                                       # single lane-dense store


def gat_aggregate(adj_t_i8, feat_t, sct, sc_l, h_t, bias_col, *,
                  num_heads, out_dim, residual):
    n = adj_t_i8.shape[0]
    hd_dim = num_heads * out_dim
    two_h = 2 * num_heads
    limit = _vmem_limit_bytes()
    tile = _pick_tile_dst(n, hd_dim, num_heads, limit - (8 << 20))

    in_arrays = [adj_t_i8, feat_t, sct, sc_l]
    in_specs = [
        pl.BlockSpec((n, tile), lambda i: (0, i)),                 # adj^T (int8, dst tile)
        _invariant_spec((hd_dim, n), lambda i: (0, 0)),            # feat_T bf16, resident
        pl.BlockSpec((two_h, tile), lambda i: (0, i)),             # scores_T (dst tile)
        _invariant_spec((n, num_heads), lambda i: (0, 0)),         # src-score cols, resident
    ]
    if residual:
        in_arrays.append(h_t)
        in_specs.append(pl.BlockSpec((hd_dim, tile), lambda i: (0, i)))   # residual tile
    in_arrays.append(bias_col)
    in_specs.append(_invariant_spec((hd_dim, 1), lambda i: (0, 0)))

    kernel = functools.partial(_gat_agg_kernel, num_heads=num_heads,
                               out_dim=out_dim, residual=residual)
    return pl.pallas_call(
        kernel,
        out_shape=jax.ShapeDtypeStruct((hd_dim, n), jnp.float32),
        grid=(pl.cdiv(n, tile),),
        in_specs=in_specs,
        out_specs=pl.BlockSpec((hd_dim, tile), lambda i: (0, i)),
        compiler_params=pltpu.CompilerParams(
            dimension_semantics=("parallel",),
            vmem_limit_bytes=limit,
        ),
    )(*in_arrays)


def gat_layer(h_t, adj_t_i8, p, *, num_heads, out_dim, residual):
    hd_dim = num_heads * out_dim
    feat_t, sct, sc_l = project(h_t, p["w_aug_t_bf16"], p["wa_l_bf16"], hd_dim=hd_dim)
    return gat_aggregate(adj_t_i8, feat_t, sct, sc_l, h_t, p["bias_col"],
                         num_heads=num_heads, out_dim=out_dim, residual=residual)


# ---------------------------------------------------------------------------
# GATNet (parameters + forward glue)
# ---------------------------------------------------------------------------
def _build_attn_matrix(attn_l, attn_r):
    """Block matrix A so that (h@W) @ A = [el_0..el_{H-1}, er_0..er_{H-1}]."""
    nh, d = attn_l.shape
    a = jnp.zeros((nh * d, 2 * nh), jnp.float32)
    for hd in range(nh):
        a = a.at[hd * d:(hd + 1) * d, hd].set(attn_l[hd])
        a = a.at[hd * d:(hd + 1) * d, nh + hd].set(attn_r[hd])
    return a


def init_gatnet(key, net_params):
    in_dim = net_params["in_dim"]
    hidden = net_params["hidden_dim"]
    out_dim = net_params["out_dim"]
    heads = net_params["n_heads"]
    n_layers = net_params["L"]
    residual = net_params["residual"]

    def normal(k, shape, scale=0.1):
        return (scale * jax.random.normal(k, shape)).astype(jnp.float32)

    keys = iter(jax.random.split(key, 2 + 4 * n_layers))
    emb_w = normal(next(keys), (in_dim, hidden * heads))
    emb_b = normal(next(keys), (hidden * heads,))
    params = {
        "embedding_h": {
            "w": emb_w, "b": emb_b,
            "w_bf16": emb_w.astype(_BF16),
            "b_col": emb_b.reshape(-1, 1),
        },
        "layers": [],
    }
    cfgs = []
    # n_layers - 1 hidden layers (out_dim=hidden, num_heads=heads), then the final
    # layer (out_dim=out_dim, num_heads=1) — as in the PyTorch module.
    layer_dims = [(hidden * heads, hidden, heads)] * (n_layers - 1) + [
        (hidden * heads, out_dim, 1)
    ]
    for din, dout, nh in layer_dims:
        attn_l = normal(next(keys), (nh, dout))
        attn_r = normal(next(keys), (nh, dout))
        w = normal(next(keys), (din, nh * dout))
        bias = normal(next(keys), (nh * dout,), scale=0.05)
        a = _build_attn_matrix(attn_l, attn_r)          # (nh*dout, 2*nh)
        wa = jnp.dot(w, a)                              # (din, 2*nh) — init-time fold
        params["layers"].append({
            "w": w, "attn_mat": a, "wa": wa, "bias": bias,
            # init-time precomputes consumed by the kernels (bf16 MXU operands):
            "w_aug_t_bf16": jnp.concatenate([w.T, wa.T], axis=0).astype(_BF16),
            "wa_l_bf16": wa[:, :nh].astype(_BF16),
            "bias_col": bias.reshape(-1, 1),
        })
        # GATLayer disables residual if in_dim != out_dim * num_heads
        cfgs.append({"num_heads": nh, "out_dim": dout,
                     "residual": residual and (din == nh * dout)})
    return params, cfgs


def gatnet_forward(params, cfgs, adj, h):
    # adj[dst, src] != 0 iff edge src -> dst; converted ONCE to an int8 src-major
    # mask reused by every layer.  The network runs feature-major (D, N) throughout.
    adj_t_i8 = (adj != 0).astype(jnp.int8).T               # adj_t[src, dst]
    h_t = embed(h.astype(jnp.float32), params["embedding_h"]["w_bf16"],
                params["embedding_h"]["b_col"])            # (hidden*heads, N)
    # in_feat_dropout / attention dropout: identity in eval mode
    for p, cfg in zip(params["layers"], cfgs):
        h_t = gat_layer(h_t, adj_t_i8, p, **cfg)
    return h_t.T                                           # back to node-major (N, out)


# ---------------------------------------------------------------------------
# Pure-JAX reference (mirrors the kernels' bf16-MXU / f32-softmax recipe)
# ---------------------------------------------------------------------------
def _ref_gat_layer(h, adj, p, num_heads, out_dim, residual):
    h_bf = h.astype(_BF16)
    feat = jnp.dot(h_bf, p["w"].astype(_BF16), preferred_element_type=jnp.float32)
    feat_bf = feat.astype(_BF16)
    scores = jnp.dot(h_bf, p["wa"].astype(_BF16), preferred_element_type=jnp.float32)
    mask = adj != 0
    outs = []
    for hd in range(num_heads):
        el = scores[:, hd][None, :]                        # (1, N) src term
        er = scores[:, num_heads + hd][:, None]            # (N, 1) dst term
        e = er + el
        e = jnp.where(e > 0.0, e, 0.2 * e)
        e = jnp.where(mask, e, -1e30)
        pm = jnp.exp(e - e.max(-1, keepdims=True))
        denom = jnp.maximum(pm.sum(-1, keepdims=True), 1e-9)
        num = jnp.dot(pm.astype(_BF16),
                      feat_bf[:, hd * out_dim:(hd + 1) * out_dim],
                      preferred_element_type=jnp.float32)
        outs.append(num / denom)
    out = jnp.concatenate(outs, axis=-1) + p["bias"]
    out = jnp.where(out > 0.0, out, jnp.exp(jnp.minimum(out, 0.0)) - 1.0)
    if residual:
        out = h + out
    return out


def _ref_forward(params, cfgs, adj, h):
    h = jnp.dot(h.astype(_BF16), params["embedding_h"]["w"].astype(_BF16),
                preferred_element_type=jnp.float32) + params["embedding_h"]["b"]
    for p, cfg in zip(params["layers"], cfgs):
        h = _ref_gat_layer(h, adj, p, **cfg)
    return h


# ---------------------------------------------------------------------------
if __name__ == "__main__":
    net_params = {
        "in_dim": 16,
        "in_dim_edge": 8,       # unused for layer_type='dgl'
        "hidden_dim": 8,
        "out_dim": 16,          # == hidden*heads so the final residual is active
        "n_heads": 2,
        "in_feat_dropout": 0.0,
        "dropout": 0.0,
        "L": 2,
        "readout": "mean",
        "batch_norm": False,
        "residual": True,
        "device": None,
        "layer_type": "dgl",
        "edge_feat": False,
    }

    N = 64
    key = jax.random.PRNGKey(0)
    k_h, k_adj, k_par = jax.random.split(key, 3)

    h = jax.random.normal(k_h, (N, net_params["in_dim"]), dtype=jnp.float32)
    # random directed graph + self loops so every node has >= 1 in-edge
    adj = (jax.random.uniform(k_adj, (N, N)) < 0.2).astype(jnp.float32)
    adj = jnp.maximum(adj, jnp.eye(N, dtype=jnp.float32))

    params, cfgs = init_gatnet(k_par, net_params)

    fwd = jax.jit(lambda a, x: gatnet_forward(params, cfgs, a, x))
    out = jax.block_until_ready(fwd(adj, h))

    ref = _ref_forward(params, cfgs, adj, h)
    assert out.shape == (N, net_params["out_dim"])
    assert bool(jnp.isfinite(out).all()), "non-finite output"
    # tolerance covers the EUP approximate-reciprocal softmax denominator
    assert jnp.allclose(out, ref, rtol=5e-3, atol=5e-3), "Pallas output != JAX reference"

    print("KERNEL_OK")
</pallas_src>

<mosaic_0001>
module attributes {stable_mosaic.version = 11 : i64} {
  func.func @_embed_kernel(%arg0: i32, %arg1: memref<64x16xf32, #tpu.memory_space<vmem>>, %arg2: memref<16x16xbf16, #tpu.memory_space<vmem>>, %arg3: memref<16x1xf32, #tpu.memory_space<vmem>>, %arg4: memref<16x64xf32, #tpu.memory_space<vmem>>) attributes {dimension_semantics = [#tpu.dimension_semantics<parallel>], iteration_bounds = array<i64: 1>, scalar_prefetch = 0 : i64, scratch_operands = 0 : i64, tpu.core_type = #tpu.core_type<tc>, window_params = [{transform_indices = @transform_0, window_bounds = array<i64: 64, 16>}, {pipeline_mode = #tpu.pipeline_mode<synchronous>, transform_indices = @transform_1, window_bounds = array<i64: 16, 16>}, {pipeline_mode = #tpu.pipeline_mode<synchronous>, transform_indices = @transform_2, window_bounds = array<i64: 16, 1>}, {transform_indices = @transform_3, window_bounds = array<i64: 16, 64>}]} {
    %c0 = arith.constant 0 : index
    %c0_0 = arith.constant 0 : index
    %0 = vector.load %arg2[%c0, %c0_0] : memref<16x16xbf16, #tpu.memory_space<vmem>>, vector<16x16xbf16>
    %c0_1 = arith.constant 0 : index
    %c0_2 = arith.constant 0 : index
    %1 = vector.load %arg1[%c0_1, %c0_2] : memref<64x16xf32, #tpu.memory_space<vmem>>, vector<64x16xf32>
    %2 = arith.truncf %1 : vector<64x16xf32> to vector<64x16xbf16>
    %cst = arith.constant dense<0.000000e+00> : vector<16x64xf32>
    %3 = tpu.matmul %0, %2, %cst {dimension_numbers = #tpu.dot_dimension_numbers<[0], [1], [1], [0], [0, 1, 1, 0], [], []>} : vector<16x16xbf16>, vector<64x16xbf16>, vector<16x64xf32> -> vector<16x64xf32>
    %c0_3 = arith.constant 0 : index
    %c0_4 = arith.constant 0 : index
    %4 = vector.load %arg3[%c0_3, %c0_4] : memref<16x1xf32, #tpu.memory_space<vmem>>, vector<16x1xf32>
    %5 = vector.broadcast %4 : vector<16x1xf32> to vector<16x64xf32>
    %6 = arith.addf %3, %5 : vector<16x64xf32>
    %c0_5 = arith.constant 0 : index
    %c0_6 = arith.constant 0 : index
    %7 = vector.load %arg4[%c0_5, %c0_6] : memref<16x64xf32, #tpu.memory_space<vmem>>, vector<16x64xf32>
    tpu.vector_store %arg4[%c0_5, %c0_6], %6 {strides = array<i32>} : memref<16x64xf32, #tpu.memory_space<vmem>>, vector<16x64xf32>,
    return
  }
  func.func @transform_0(%arg0: i32) -> (i32, i32) {
    %c0_i32 = arith.constant 0 : i32
    %c0_i32_0 = arith.constant 0 : i32
    return %arg0, %c0_i32 : i32, i32
  }
  func.func @transform_1(%arg0: i32) -> (i32, i32) {
    %c0_i32 = arith.constant 0 : i32
    %c0_i32_0 = arith.constant 0 : i32
    %c0_i32_1 = arith.constant 0 : i32
    return %c0_i32, %c0_i32_0 : i32, i32
  }
  func.func @transform_2(%arg0: i32) -> (i32, i32) {
    %c0_i32 = arith.constant 0 : i32
    %c0_i32_0 = arith.constant 0 : i32
    %c0_i32_1 = arith.constant 0 : i32
    return %c0_i32, %c0_i32_0 : i32, i32
  }
  func.func @transform_3(%arg0: i32) -> (i32, i32) {
    %c0_i32 = arith.constant 0 : i32
    %c0_i32_0 = arith.constant 0 : i32
    return %c0_i32, %arg0 : i32, i32
  }
}

module attributes {stable_mosaic.version = 11 : i64} {
  func.func @_project_kernel(%arg0: i32, %arg1: memref<16x64xf32, #tpu.memory_space<vmem>>, %arg2: memref<18x16xbf16, #tpu.memory_space<vmem>>, %arg3: memref<16x1xbf16, #tpu.memory_space<vmem>>, %arg4: memref<16x64xbf16, #tpu.memory_space<vmem>>, %arg5: memref<2x64xf32, #tpu.memory_space<vmem>>, %arg6: memref<64x1xf32, #tpu.memory_space<vmem>>) attributes {dimension_semantics = [#tpu.dimension_semantics<parallel>], iteration_bounds = array<i64: 1>, scalar_prefetch = 0 : i64, scratch_operands = 0 : i64, tpu.core_type = #tpu.core_type<tc>, window_params = [{transform_indices = @transform_0, window_bounds = array<i64: 16, 64>}, {pipeline_mode = #tpu.pipeline_mode<synchronous>, transform_indices = @transform_1, window_bounds = array<i64: 18, 16>}, {pipeline_mode = #tpu.pipeline_mode<synchronous>, transform_indices = @transform_2, window_bounds = array<i64: 16, 1>}, {transform_indices = @transform_3, window_bounds = array<i64: 16, 64>}, {transform_indices = @transform_4, window_bounds = array<i64: 2, 64>}, {transform_indices = @transform_5, window_bounds = array<i64: 64, 1>}]} {
    %c0 = arith.constant 0 : index
    %c0_0 = arith.constant 0 : index
    %0 = vector.load %arg1[%c0, %c0_0] : memref<16x64xf32, #tpu.memory_space<vmem>>, vector<16x64xf32>
    %1 = arith.truncf %0 : vector<16x64xf32> to vector<16x64xbf16>
    %c0_1 = arith.constant 0 : index
    %c0_2 = arith.constant 0 : index
    %2 = vector.load %arg2[%c0_1, %c0_2] : memref<18x16xbf16, #tpu.memory_space<vmem>>, vector<18x16xbf16>
    %cst = arith.constant dense<0.000000e+00> : vector<18x64xf32>
    %3 = tpu.matmul %2, %1, %cst {dimension_numbers = #tpu.dot_dimension_numbers<[1], [0], [0], [1], [0, 0, 1, 1], [], []>} : vector<18x16xbf16>, vector<16x64xbf16>, vector<18x64xf32> -> vector<18x64xf32>
    %4 = vector.extract_strided_slice %3 {offsets = [0, 0], sizes = [16, 64], strides = [1, 1]} : vector<18x64xf32> to vector<16x64xf32>
    %5 = arith.truncf %4 : vector<16x64xf32> to vector<16x64xbf16>
    %c0_3 = arith.constant 0 : index
    %c0_4 = arith.constant 0 : index
    %6 = vector.load %arg4[%c0_3, %c0_4] : memref<16x64xbf16, #tpu.memory_space<vmem>>, vector<16x64xbf16>
    tpu.vector_store %arg4[%c0_3, %c0_4], %5 {strides = array<i32>} : memref<16x64xbf16, #tpu.memory_space<vmem>>, vector<16x64xbf16>,
    %7 = vector.extract_strided_slice %3 {offsets = [16, 0], sizes = [2, 64], strides = [1, 1]} : vector<18x64xf32> to vector<2x64xf32>
    %c0_5 = arith.constant 0 : index
    %c0_6 = arith.constant 0 : index
    %8 = vector.load %arg5[%c0_5, %c0_6] : memref<2x64xf32, #tpu.memory_space<vmem>>, vector<2x64xf32>
    tpu.vector_store %arg5[%c0_5, %c0_6], %7 {strides = array<i32>} : memref<2x64xf32, #tpu.memory_space<vmem>>, vector<2x64xf32>,
    %c0_7 = arith.constant 0 : index
    %c0_8 = arith.constant 0 : index
    %9 = vector.load %arg3[%c0_7, %c0_8] : memref<16x1xbf16, #tpu.memory_space<vmem>>, vector<16x1xbf16>
    %cst_9 = arith.constant dense<0.000000e+00> : vector<64x1xf32>
    %10 = tpu.matmul %1, %9, %cst_9 {dimension_numbers = #tpu.dot_dimension_numbers<[0], [0], [1], [1], [0, 1, 1, 1], [], []>} : vector<16x64xbf16>, vector<16x1xbf16>, vector<64x1xf32> -> vector<64x1xf32>
    %c0_10 = arith.constant 0 : index
    %c0_11 = arith.constant 0 : index
    %11 = vector.load %arg6[%c0_10, %c0_11] : memref<64x1xf32, #tpu.memory_space<vmem>>, vector<64x1xf32>
    tpu.vector_store %arg6[%c0_10, %c0_11], %10 {strides = array<i32>} : memref<64x1xf32, #tpu.memory_space<vmem>>, vector<64x1xf32>,
    return
  }
  func.func @transform_0(%arg0: i32) -> (i32, i32) {
    %c0_i32 = arith.constant 0 : i32
    %c0_i32_0 = arith.constant 0 : i32
    return %c0_i32, %arg0 : i32, i32
  }
  func.func @transform_1(%arg0: i32) -> (i32, i32) {
    %c0_i32 = arith.constant 0 : i32
    %c0_i32_0 = arith.constant 0 : i32
    %c0_i32_1 = arith.constant 0 : i32
    return %c0_i32, %c0_i32_0 : i32, i32
  }
  func.func @transform_2(%arg0: i32) -> (i32, i32) {
    %c0_i32 = arith.constant 0 : i32
    %c0_i32_0 = arith.constant 0 : i32
    %c0_i32_1 = arith.constant 0 : i32
    return %c0_i32, %c0_i32_0 : i32, i32
  }
  func.func @transform_3(%arg0: i32) -> (i32, i32) {
    %c0_i32 = arith.constant 0 : i32
    %c0_i32_0 = arith.constant 0 : i32
    return %c0_i32, %arg0 : i32, i32
  }
  func.func @transform_4(%arg0: i32) -> (i32, i32) {
    %c0_i32 = arith.constant 0 : i32
    %c0_i32_0 = arith.constant 0 : i32
    return %c0_i32, %arg0 : i32, i32
  }
  func.func @transform_5(%arg0: i32) -> (i32, i32) {
    %c0_i32 = arith.constant 0 : i32
    %c0_i32_0 = arith.constant 0 : i32
    return %arg0, %c0_i32 : i32, i32
  }
}

module attributes {stable_mosaic.version = 11 : i64} {
  func.func @_project_kernel(%arg0: i32, %arg1: memref<16x64xf32, #tpu.memory_space<vmem>>, %arg2: memref<20x16xbf16, #tpu.memory_space<vmem>>, %arg3: memref<16x2xbf16, #tpu.memory_space<vmem>>, %arg4: memref<16x64xbf16, #tpu.memory_space<vmem>>, %arg5: memref<4x64xf32, #tpu.memory_space<vmem>>, %arg6: memref<64x2xf32, #tpu.memory_space<vmem>>) attributes {dimension_semantics = [#tpu.dimension_semantics<parallel>], iteration_bounds = array<i64: 1>, scalar_prefetch = 0 : i64, scratch_operands = 0 : i64, tpu.core_type = #tpu.core_type<tc>, window_params = [{transform_indices = @transform_0, window_bounds = array<i64: 16, 64>}, {pipeline_mode = #tpu.pipeline_mode<synchronous>, transform_indices = @transform_1, window_bounds = array<i64: 20, 16>}, {pipeline_mode = #tpu.pipeline_mode<synchronous>, transform_indices = @transform_2, window_bounds = array<i64: 16, 2>}, {transform_indices = @transform_3, window_bounds = array<i64: 16, 64>}, {transform_indices = @transform_4, window_bounds = array<i64: 4, 64>}, {transform_indices = @transform_5, window_bounds = array<i64: 64, 2>}]} {
    %c0 = arith.constant 0 : index
    %c0_0 = arith.constant 0 : index
    %0 = vector.load %arg1[%c0, %c0_0] : memref<16x64xf32, #tpu.memory_space<vmem>>, vector<16x64xf32>
    %1 = arith.truncf %0 : vector<16x64xf32> to vector<16x64xbf16>
    %c0_1 = arith.constant 0 : index
    %c0_2 = arith.constant 0 : index
    %2 = vector.load %arg2[%c0_1, %c0_2] : memref<20x16xbf16, #tpu.memory_space<vmem>>, vector<20x16xbf16>
    %cst = arith.constant dense<0.000000e+00> : vector<20x64xf32>
    %3 = tpu.matmul %2, %1, %cst {dimension_numbers = #tpu.dot_dimension_numbers<[1], [0], [0], [1], [0, 0, 1, 1], [], []>} : vector<20x16xbf16>, vector<16x64xbf16>, vector<20x64xf32> -> vector<20x64xf32>
    %4 = vector.extract_strided_slice %3 {offsets = [0, 0], sizes = [16, 64], strides = [1, 1]} : vector<20x64xf32> to vector<16x64xf32>
    %5 = arith.truncf %4 : vector<16x64xf32> to vector<16x64xbf16>
    %c0_3 = arith.constant 0 : index
    %c0_4 = arith.constant 0 : index
    %6 = vector.load %arg4[%c0_3, %c0_4] : memref<16x64xbf16, #tpu.memory_space<vmem>>, vector<16x64xbf16>
    tpu.vector_store %arg4[%c0_3, %c0_4], %5 {strides = array<i32>} : memref<16x64xbf16, #tpu.memory_space<vmem>>, vector<16x64xbf16>,
    %7 = vector.extract_strided_slice %3 {offsets = [16, 0], sizes = [4, 64], strides = [1, 1]} : vector<20x64xf32> to vector<4x64xf32>
    %c0_5 = arith.constant 0 : index
    %c0_6 = arith.constant 0 : index
    %8 = vector.load %arg5[%c0_5, %c0_6] : memref<4x64xf32, #tpu.memory_space<vmem>>, vector<4x64xf32>
    tpu.vector_store %arg5[%c0_5, %c0_6], %7 {strides = array<i32>} : memref<4x64xf32, #tpu.memory_space<vmem>>, vector<4x64xf32>,
    %c0_7 = arith.constant 0 : index
    %c0_8 = arith.constant 0 : index
    %9 = vector.load %arg3[%c0_7, %c0_8] : memref<16x2xbf16, #tpu.memory_space<vmem>>, vector<16x2xbf16>
    %cst_9 = arith.constant dense<0.000000e+00> : vector<64x2xf32>
    %10 = tpu.matmul %1, %9, %cst_9 {dimension_numbers = #tpu.dot_dimension_numbers<[0], [0], [1], [1], [0, 1, 1, 1], [], []>} : vector<16x64xbf16>, vector<16x2xbf16>, vector<64x2xf32> -> vector<64x2xf32>
    %c0_10 = arith.constant 0 : index
    %c0_11 = arith.constant 0 : index
    %11 = vector.load %arg6[%c0_10, %c0_11] : memref<64x2xf32, #tpu.memory_space<vmem>>, vector<64x2xf32>
    tpu.vector_store %arg6[%c0_10, %c0_11], %10 {strides = array<i32>} : memref<64x2xf32, #tpu.memory_space<vmem>>, vector<64x2xf32>,
    return
  }
  func.func @transform_0(%arg0: i32) -> (i32, i32) {
    %c0_i32 = arith.constant 0 : i32
    %c0_i32_0 = arith.constant 0 : i32
    return %c0_i32, %arg0 : i32, i32
  }
  func.func @transform_1(%arg0: i32) -> (i32, i32) {
    %c0_i32 = arith.constant 0 : i32
    %c0_i32_0 = arith.constant 0 : i32
    %c0_i32_1 = arith.constant 0 : i32
    return %c0_i32, %c0_i32_0 : i32, i32
  }
  func.func @transform_2(%arg0: i32) -> (i32, i32) {
    %c0_i32 = arith.constant 0 : i32
    %c0_i32_0 = arith.constant 0 : i32
    %c0_i32_1 = arith.constant 0 : i32
    return %c0_i32, %c0_i32_0 : i32, i32
  }
  func.func @transform_3(%arg0: i32) -> (i32, i32) {
    %c0_i32 = arith.constant 0 : i32
    %c0_i32_0 = arith.constant 0 : i32
    return %c0_i32, %arg0 : i32, i32
  }
  func.func @transform_4(%arg0: i32) -> (i32, i32) {
    %c0_i32 = arith.constant 0 : i32
    %c0_i32_0 = arith.constant 0 : i32
    return %c0_i32, %arg0 : i32, i32
  }
  func.func @transform_5(%arg0: i32) -> (i32, i32) {
    %c0_i32 = arith.constant 0 : i32
    %c0_i32_0 = arith.constant 0 : i32
    return %arg0, %c0_i32 : i32, i32
  }
}

module attributes {stable_mosaic.version = 11 : i64} {
  func.func @_gat_agg_kernel(%arg0: i32, %arg1: memref<64x64xi8, #tpu.memory_space<vmem>>, %arg2: memref<16x64xbf16, #tpu.memory_space<vmem>>, %arg3: memref<4x64xf32, #tpu.memory_space<vmem>>, %arg4: memref<64x2xf32, #tpu.memory_space<vmem>>, %arg5: memref<16x64xf32, #tpu.memory_space<vmem>>, %arg6: memref<16x1xf32, #tpu.memory_space<vmem>>, %arg7: memref<16x64xf32, #tpu.memory_space<vmem>>) attributes {dimension_semantics = [#tpu.dimension_semantics<parallel>], iteration_bounds = array<i64: 1>, scalar_prefetch = 0 : i64, scratch_operands = 0 : i64, tpu.core_type = #tpu.core_type<tc>, window_params = [{transform_indices = @transform_0, window_bounds = array<i64: 64, 64>}, {pipeline_mode = #tpu.pipeline_mode<synchronous>, transform_indices = @transform_1, window_bounds = array<i64: 16, 64>}, {transform_indices = @transform_2, window_bounds = array<i64: 4, 64>}, {pipeline_mode = #tpu.pipeline_mode<synchronous>, transform_indices = @transform_3, window_bounds = array<i64: 64, 2>}, {transform_indices = @transform_4, window_bounds = array<i64: 16, 64>}, {pipeline_mode = #tpu.pipeline_mode<synchronous>, transform_indices = @transform_5, window_bounds = array<i64: 16, 1>}, {transform_indices = @transform_6, window_bounds = array<i64: 16, 64>}]} {
    %c0 = arith.constant 0 : index
    %c0_0 = arith.constant 0 : index
    %0 = vector.load %arg1[%c0, %c0_0] : memref<64x64xi8, #tpu.memory_space<vmem>>, vector<64x64xi8>
    %c0_i8 = arith.constant 0 : i8
    %1 = vector.broadcast %c0_i8 : i8 to vector<64x64xi8>
    %2 = arith.cmpi ne, %0, %1 : vector<64x64xi8>
    %c0_1 = arith.constant 0 : index
    %c0_2 = arith.constant 0 : index
    %3 = vector.load %arg4[%c0_1, %c0_2] : memref<64x2xf32, #tpu.memory_space<vmem>>, vector<64x1xf32>
    %c2 = arith.constant 2 : index
    %c0_3 = arith.constant 0 : index
    %4 = vector.load %arg3[%c2, %c0_3] : memref<4x64xf32, #tpu.memory_space<vmem>>, vector<1x64xf32>
    %5 = vector.broadcast %3 : vector<64x1xf32> to vector<64x64xf32>
    %6 = vector.broadcast %4 : vector<1x64xf32> to vector<64x64xf32>
    %7 = arith.addf %5, %6 : vector<64x64xf32>
    %cst = arith.constant 0.000000e+00 : f32
    %8 = vector.broadcast %cst : f32 to vector<64x64xf32>
    %9 = arith.cmpf ogt, %7, %8 : vector<64x64xf32>
    %cst_4 = arith.constant 2.000000e-01 : f32
    %10 = vector.broadcast %cst_4 : f32 to vector<64x64xf32>
    %11 = arith.mulf %10, %7 : vector<64x64xf32>
    %12 = arith.select %9, %7, %11 : vector<64x64xi1>, vector<64x64xf32>
    %cst_5 = arith.constant -1.000000e+30 : f32
    %13 = vector.broadcast %cst_5 : f32 to vector<64x64xf32>
    %14 = arith.select %2, %12, %13 : vector<64x64xi1>, vector<64x64xf32>
    %cst_6 = arith.constant dense<0xFF800000> : vector<64xf32>
    %15 = vector.multi_reduction <maximumf>, %14, %cst_6 [0] : vector<64x64xf32> to vector<64xf32>
    %16 = vector.shape_cast %15 : vector<64xf32> to vector<1x64xf32>
    %17 = vector.broadcast %16 : vector<1x64xf32> to vector<64x64xf32>
    %18 = arith.subf %14, %17 : vector<64x64xf32>
    %19 = math.exp %18 : vector<64x64xf32>
    %cst_7 = arith.constant dense<0.000000e+00> : vector<64xf32>
    %20 = vector.multi_reduction <add>, %19, %cst_7 [0] : vector<64x64xf32> to vector<64xf32>
    %21 = vector.shape_cast %20 : vector<64xf32> to vector<1x64xf32>
    %cst_8 = arith.constant 9.99999971E-10 : f32
    %22 = vector.broadcast %cst_8 : f32 to vector<1x64xf32>
    %23 = arith.maximumf %21, %22 : vector<1x64xf32>
    %c0_9 = arith.constant 0 : index
    %c0_10 = arith.constant 0 : index
    %24 = vector.load %arg2[%c0_9, %c0_10] : memref<16x64xbf16, #tpu.memory_space<vmem>>, vector<8x64xbf16>
    %25 = arith.truncf %19 : vector<64x64xf32> to vector<64x64xbf16>
    %cst_11 = arith.constant dense<0.000000e+00> : vector<8x64xf32>
    %26 = tpu.matmul %24, %25, %cst_11 {dimension_numbers = #tpu.dot_dimension_numbers<[1], [0], [0], [1], [0, 0, 1, 1], [], []>} : vector<8x64xbf16>, vector<64x64xbf16>, vector<8x64xf32> -> vector<8x64xf32>
    %27 = tpu.reciprocal %23 {approx = true} : vector<1x64xf32> -> vector<1x64xf32>
    %28 = vector.broadcast %27 : vector<1x64xf32> to vector<8x64xf32>
    %29 = arith.mulf %26, %28 : vector<8x64xf32>
    %c0_12 = arith.constant 0 : index
    %c1 = arith.constant 1 : index
    %30 = vector.load %arg4[%c0_12, %c1] : memref<64x2xf32, #tpu.memory_space<vmem>>, vector<64x1xf32>
    %c3 = arith.constant 3 : index
    %c0_13 = arith.constant 0 : index
    %31 = vector.load %arg3[%c3, %c0_13] : memref<4x64xf32, #tpu.memory_space<vmem>>, vector<1x64xf32>
    %32 = vector.broadcast %30 : vector<64x1xf32> to vector<64x64xf32>
    %33 = vector.broadcast %31 : vector<1x64xf32> to vector<64x64xf32>
    %34 = arith.addf %32, %33 : vector<64x64xf32>
    %cst_14 = arith.constant 0.000000e+00 : f32
    %35 = vector.broadcast %cst_14 : f32 to vector<64x64xf32>
    %36 = arith.cmpf ogt, %34, %35 : vector<64x64xf32>
    %cst_15 = arith.constant 2.000000e-01 : f32
    %37 = vector.broadcast %cst_15 : f32 to vector<64x64xf32>
    %38 = arith.mulf %37, %34 : vector<64x64xf32>
    %39 = arith.select %36, %34, %38 : vector<64x64xi1>, vector<64x64xf32>
    %cst_16 = arith.constant -1.000000e+30 : f32
    %40 = vector.broadcast %cst_16 : f32 to vector<64x64xf32>
    %41 = arith.select %2, %39, %40 : vector<64x64xi1>, vector<64x64xf32>
    %cst_17 = arith.constant dense<0xFF800000> : vector<64xf32>
    %42 = vector.multi_reduction <maximumf>, %41, %cst_17 [0] : vector<64x64xf32> to vector<64xf32>
    %43 = vector.shape_cast %42 : vector<64xf32> to vector<1x64xf32>
    %44 = vector.broadcast %43 : vector<1x64xf32> to vector<64x64xf32>
    %45 = arith.subf %41, %44 : vector<64x64xf32>
    %46 = math.exp %45 : vector<64x64xf32>
    %cst_18 = arith.constant dense<0.000000e+00> : vector<64xf32>
    %47 = vector.multi_reduction <add>, %46, %cst_18 [0] : vector<64x64xf32> to vector<64xf32>
    %48 = vector.shape_cast %47 : vector<64xf32> to vector<1x64xf32>
    %cst_19 = arith.constant 9.99999971E-10 : f32
    %49 = vector.broadcast %cst_19 : f32 to vector<1x64xf32>
    %50 = arith.maximumf %48, %49 : vector<1x64xf32>
    %c8 = arith.constant 8 : index
    %c0_20 = arith.constant 0 : index
    %51 = vector.load %arg2[%c8, %c0_20] : memref<16x64xbf16, #tpu.memory_space<vmem>>, vector<8x64xbf16>
    %52 = arith.truncf %46 : vector<64x64xf32> to vector<64x64xbf16>
    %cst_21 = arith.constant dense<0.000000e+00> : vector<8x64xf32>
    %53 = tpu.matmul %51, %52, %cst_21 {dimension_numbers = #tpu.dot_dimension_numbers<[1], [0], [0], [1], [0, 0, 1, 1], [], []>} : vector<8x64xbf16>, vector<64x64xbf16>, vector<8x64xf32> -> vector<8x64xf32>
    %54 = tpu.reciprocal %50 {approx = true} : vector<1x64xf32> -> vector<1x64xf32>
    %55 = vector.broadcast %54 : vector<1x64xf32> to vector<8x64xf32>
    %56 = arith.mulf %53, %55 : vector<8x64xf32>
    %57 = tpu.concatenate %29, %56 in 0 : vector<8x64xf32>, vector<8x64xf32> -> vector<16x64xf32>
    %c0_22 = arith.constant 0 : index
    %c0_23 = arith.constant 0 : index
    %58 = vector.load %arg6[%c0_22, %c0_23] : memref<16x1xf32, #tpu.memory_space<vmem>>, vector<16x1xf32>
    %59 = vector.broadcast %58 : vector<16x1xf32> to vector<16x64xf32>
    %60 = arith.addf %57, %59 : vector<16x64xf32>
    %cst_24 = arith.constant 0.000000e+00 : f32
    %61 = vector.broadcast %cst_24 : f32 to vector<16x64xf32>
    %62 = arith.cmpf ogt, %60, %61 : vector<16x64xf32>
    %cst_25 = arith.constant 0.000000e+00 : f32
    %63 = vector.broadcast %cst_25 : f32 to vector<16x64xf32>
    %64 = arith.minimumf %60, %63 : vector<16x64xf32>
    %65 = math.exp %64 : vector<16x64xf32>
    %cst_26 = arith.constant 1.000000e+00 : f32
    %66 = vector.broadcast %cst_26 : f32 to vector<16x64xf32>
    %67 = arith.subf %65, %66 : vector<16x64xf32>
    %68 = arith.select %62, %60, %67 : vector<16x64xi1>, vector<16x64xf32>
    %c0_27 = arith.constant 0 : index
    %c0_28 = arith.constant 0 : index
    %69 = vector.load %arg5[%c0_27, %c0_28] : memref<16x64xf32, #tpu.memory_space<vmem>>, vector<16x64xf32>
    %70 = arith.addf %68, %69 : vector<16x64xf32>
    %c0_29 = arith.constant 0 : index
    %c0_30 = arith.constant 0 : index
    %71 = vector.load %arg7[%c0_29, %c0_30] : memref<16x64xf32, #tpu.memory_space<vmem>>, vector<16x64xf32>
    tpu.vector_store %arg7[%c0_29, %c0_30], %70 {strides = array<i32>} : memref<16x64xf32, #tpu.memory_space<vmem>>, vector<16x64xf32>,
    return
  }
  func.func @transform_0(%arg0: i32) -> (i32, i32) {
    %c0_i32 = arith.constant 0 : i32
    %c0_i32_0 = arith.constant 0 : i32
    return %c0_i32, %arg0 : i32, i32
  }
  func.func @transform_1(%arg0: i32) -> (i32, i32) {
    %c0_i32 = arith.constant 0 : i32
    %c0_i32_0 = arith.constant 0 : i32
    %c0_i32_1 = arith.constant 0 : i32
    return %c0_i32, %c0_i32_0 : i32, i32
  }
  func.func @transform_2(%arg0: i32) -> (i32, i32) {
    %c0_i32 = arith.constant 0 : i32
    %c0_i32_0 = arith.constant 0 : i32
    return %c0_i32, %arg0 : i32, i32
  }
  func.func @transform_3(%arg0: i32) -> (i32, i32) {
    %c0_i32 = arith.constant 0 : i32
    %c0_i32_0 = arith.constant 0 : i32
    %c0_i32_1 = arith.constant 0 : i32
    return %c0_i32, %c0_i32_0 : i32, i32
  }
  func.func @transform_4(%arg0: i32) -> (i32, i32) {
    %c0_i32 = arith.constant 0 : i32
    %c0_i32_0 = arith.constant 0 : i32
    return %c0_i32, %arg0 : i32, i32
  }
  func.func @transform_5(%arg0: i32) -> (i32, i32) {
    %c0_i32 = arith.constant 0 : i32
    %c0_i32_0 = arith.constant 0 : i32
    %c0_i32_1 = arith.constant 0 : i32
    return %c0_i32, %c0_i32_0 : i32, i32
  }
  func.func @transform_6(%arg0: i32) -> (i32, i32) {
    %c0_i32 = arith.constant 0 : i32
    %c0_i32_0 = arith.constant 0 : i32
    return %c0_i32, %arg0 : i32, i32
  }
}

module attributes {stable_mosaic.version = 11 : i64} {
  func.func @_gat_agg_kernel(%arg0: i32, %arg1: memref<64x64xi8, #tpu.memory_space<vmem>>, %arg2: memref<16x64xbf16, #tpu.memory_space<vmem>>, %arg3: memref<2x64xf32, #tpu.memory_space<vmem>>, %arg4: memref<64x1xf32, #tpu.memory_space<vmem>>, %arg5: memref<16x64xf32, #tpu.memory_space<vmem>>, %arg6: memref<16x1xf32, #tpu.memory_space<vmem>>, %arg7: memref<16x64xf32, #tpu.memory_space<vmem>>) attributes {dimension_semantics = [#tpu.dimension_semantics<parallel>], iteration_bounds = array<i64: 1>, scalar_prefetch = 0 : i64, scratch_operands = 0 : i64, tpu.core_type = #tpu.core_type<tc>, window_params = [{transform_indices = @transform_0, window_bounds = array<i64: 64, 64>}, {pipeline_mode = #tpu.pipeline_mode<synchronous>, transform_indices = @transform_1, window_bounds = array<i64: 16, 64>}, {transform_indices = @transform_2, window_bounds = array<i64: 2, 64>}, {pipeline_mode = #tpu.pipeline_mode<synchronous>, transform_indices = @transform_3, window_bounds = array<i64: 64, 1>}, {transform_indices = @transform_4, window_bounds = array<i64: 16, 64>}, {pipeline_mode = #tpu.pipeline_mode<synchronous>, transform_indices = @transform_5, window_bounds = array<i64: 16, 1>}, {transform_indices = @transform_6, window_bounds = array<i64: 16, 64>}]} {
    %c0 = arith.constant 0 : index
    %c0_0 = arith.constant 0 : index
    %0 = vector.load %arg1[%c0, %c0_0] : memref<64x64xi8, #tpu.memory_space<vmem>>, vector<64x64xi8>
    %c0_i8 = arith.constant 0 : i8
    %1 = vector.broadcast %c0_i8 : i8 to vector<64x64xi8>
    %2 = arith.cmpi ne, %0, %1 : vector<64x64xi8>
    %c0_1 = arith.constant 0 : index
    %c0_2 = arith.constant 0 : index
    %3 = vector.load %arg4[%c0_1, %c0_2] : memref<64x1xf32, #tpu.memory_space<vmem>>, vector<64x1xf32>
    %c1 = arith.constant 1 : index
    %c0_3 = arith.constant 0 : index
    %4 = vector.load %arg3[%c1, %c0_3] : memref<2x64xf32, #tpu.memory_space<vmem>>, vector<1x64xf32>
    %5 = vector.broadcast %3 : vector<64x1xf32> to vector<64x64xf32>
    %6 = vector.broadcast %4 : vector<1x64xf32> to vector<64x64xf32>
    %7 = arith.addf %5, %6 : vector<64x64xf32>
    %cst = arith.constant 0.000000e+00 : f32
    %8 = vector.broadcast %cst : f32 to vector<64x64xf32>
    %9 = arith.cmpf ogt, %7, %8 : vector<64x64xf32>
    %cst_4 = arith.constant 2.000000e-01 : f32
    %10 = vector.broadcast %cst_4 : f32 to vector<64x64xf32>
    %11 = arith.mulf %10, %7 : vector<64x64xf32>
    %12 = arith.select %9, %7, %11 : vector<64x64xi1>, vector<64x64xf32>
    %cst_5 = arith.constant -1.000000e+30 : f32
    %13 = vector.broadcast %cst_5 : f32 to vector<64x64xf32>
    %14 = arith.select %2, %12, %13 : vector<64x64xi1>, vector<64x64xf32>
    %cst_6 = arith.constant dense<0xFF800000> : vector<64xf32>
    %15 = vector.multi_reduction <maximumf>, %14, %cst_6 [0] : vector<64x64xf32> to vector<64xf32>
    %16 = vector.shape_cast %15 : vector<64xf32> to vector<1x64xf32>
    %17 = vector.broadcast %16 : vector<1x64xf32> to vector<64x64xf32>
    %18 = arith.subf %14, %17 : vector<64x64xf32>
    %19 = math.exp %18 : vector<64x64xf32>
    %cst_7 = arith.constant dense<0.000000e+00> : vector<64xf32>
    %20 = vector.multi_reduction <add>, %19, %cst_7 [0] : vector<64x64xf32> to vector<64xf32>
    %21 = vector.shape_cast %20 : vector<64xf32> to vector<1x64xf32>
    %cst_8 = arith.constant 9.99999971E-10 : f32
    %22 = vector.broadcast %cst_8 : f32 to vector<1x64xf32>
    %23 = arith.maximumf %21, %22 : vector<1x64xf32>
    %c0_9 = arith.constant 0 : index
    %c0_10 = arith.constant 0 : index
    %24 = vector.load %arg2[%c0_9, %c0_10] : memref<16x64xbf16, #tpu.memory_space<vmem>>, vector<16x64xbf16>
    %25 = arith.truncf %19 : vector<64x64xf32> to vector<64x64xbf16>
    %cst_11 = arith.constant dense<0.000000e+00> : vector<16x64xf32>
    %26 = tpu.matmul %24, %25, %cst_11 {dimension_numbers = #tpu.dot_dimension_numbers<[1], [0], [0], [1], [0, 0, 1, 1], [], []>} : vector<16x64xbf16>, vector<64x64xbf16>, vector<16x64xf32> -> vector<16x64xf32>
    %27 = tpu.reciprocal %23 {approx = true} : vector<1x64xf32> -> vector<1x64xf32>
    %28 = vector.broadcast %27 : vector<1x64xf32> to vector<16x64xf32>
    %29 = arith.mulf %26, %28 : vector<16x64xf32>
    %c0_12 = arith.constant 0 : index
    %c0_13 = arith.constant 0 : index
    %30 = vector.load %arg6[%c0_12, %c0_13] : memref<16x1xf32, #tpu.memory_space<vmem>>, vector<16x1xf32>
    %31 = vector.broadcast %30 : vector<16x1xf32> to vector<16x64xf32>
    %32 = arith.addf %29, %31 : vector<16x64xf32>
    %cst_14 = arith.constant 0.000000e+00 : f32
    %33 = vector.broadcast %cst_14 : f32 to vector<16x64xf32>
    %34 = arith.cmpf ogt, %32, %33 : vector<16x64xf32>
    %cst_15 = arith.constant 0.000000e+00 : f32
    %35 = vector.broadcast %cst_15 : f32 to vector<16x64xf32>
    %36 = arith.minimumf %32, %35 : vector<16x64xf32>
    %37 = math.exp %36 : vector<16x64xf32>
    %cst_16 = arith.constant 1.000000e+00 : f32
    %38 = vector.broadcast %cst_16 : f32 to vector<16x64xf32>
    %39 = arith.subf %37, %38 : vector<16x64xf32>
    %40 = arith.select %34, %32, %39 : vector<16x64xi1>, vector<16x64xf32>
    %c0_17 = arith.constant 0 : index
    %c0_18 = arith.constant 0 : index
    %41 = vector.load %arg5[%c0_17, %c0_18] : memref<16x64xf32, #tpu.memory_space<vmem>>, vector<16x64xf32>
    %42 = arith.addf %40, %41 : vector<16x64xf32>
    %c0_19 = arith.constant 0 : index
    %c0_20 = arith.constant 0 : index
    %43 = vector.load %arg7[%c0_19, %c0_20] : memref<16x64xf32, #tpu.memory_space<vmem>>, vector<16x64xf32>
    tpu.vector_store %arg7[%c0_19, %c0_20], %42 {strides = array<i32>} : memref<16x64xf32, #tpu.memory_space<vmem>>, vector<16x64xf32>,
    return
  }
  func.func @transform_0(%arg0: i32) -> (i32, i32) {
    %c0_i32 = arith.constant 0 : i32
    %c0_i32_0 = arith.constant 0 : i32
    return %c0_i32, %arg0 : i32, i32
  }
  func.func @transform_1(%arg0: i32) -> (i32, i32) {
    %c0_i32 = arith.constant 0 : i32
    %c0_i32_0 = arith.constant 0 : i32
    %c0_i32_1 = arith.constant 0 : i32
    return %c0_i32, %c0_i32_0 : i32, i32
  }
  func.func @transform_2(%arg0: i32) -> (i32, i32) {
    %c0_i32 = arith.constant 0 : i32
    %c0_i32_0 = arith.constant 0 : i32
    return %c0_i32, %arg0 : i32, i32
  }
  func.func @transform_3(%arg0: i32) -> (i32, i32) {
    %c0_i32 = arith.constant 0 : i32
    %c0_i32_0 = arith.constant 0 : i32
    %c0_i32_1 = arith.constant 0 : i32
    return %c0_i32, %c0_i32_0 : i32, i32
  }
  func.func @transform_4(%arg0: i32) -> (i32, i32) {
    %c0_i32 = arith.constant 0 : i32
    %c0_i32_0 = arith.constant 0 : i32
    return %c0_i32, %arg0 : i32, i32
  }
  func.func @transform_5(%arg0: i32) -> (i32, i32) {
    %c0_i32 = arith.constant 0 : i32
    %c0_i32_0 = arith.constant 0 : i32
    %c0_i32_1 = arith.constant 0 : i32
    return %c0_i32, %c0_i32_0 : i32, i32
  }
  func.func @transform_6(%arg0: i32) -> (i32, i32) {
    %c0_i32 = arith.constant 0 : i32
    %c0_i32_0 = arith.constant 0 : i32
    return %c0_i32, %arg0 : i32, i32
  }
}

</mosaic_0001>

<bundles_post_ra>
// kernel: _lambda_.5
= control target key start
LH: loop header
LB: loop body
LE: loop exit
PB: predicated region body
PF: predicated region fallthrough
CT: control target
= control target key end

     0   :  { %vm63_vm0 = vcmask 130048   ;;  %v109_v19 = vmov 0   ;;  %vm93_vm1 = vcmask 523264   ;;  %s174_s1 = inlined_call_operand.vmem [shape: bf16[16,16], index: 1, kind: input, shape index: {}]   ;;  %s175_s0 = inlined_call_operand.vmem [shape: f32[64,16], index: 0, kind: input, shape index: {}]   ;;  %s176_s2 = inlined_call_operand.vmem [shape: f32[16,1], index: 2, kind: input, shape index: {}]   ;;  %s177_s3 = inlined_call_operand.vmem [shape: f32[16,64], index: 3, kind: output, shape index: {}]  }
   0x1   :  { %v105_v0 = vld [vmem:[%s174_s1] sm:$0xff]  ;;  %v23_v1 = vld [vmem:[%s175_s0 + $0x30] sm:$0xff]  ;;  %v24_v2 = vld [vmem:[%s175_s0 + $0x38] sm:$0xff]  ;;  %108 = vset.pattern.permute.xlu1 %v109_v19 }
   0x2   :  { %v28_v3 = vpack.c.bf16 %v24_v2, %v23_v1  ;;  %47 = vxpose.xlu0.c.b16.start.end [1/1] (short) (narrow) %v105_v0, 16  ;;  %v21_v4 = vld [vmem:[%s175_s0 + $0x20] sm:$0xff]  ;;  %v22_v5 = vld [vmem:[%s175_s0 + $0x28] sm:$0xff]  ;;  %v19_v9 = vld [vmem:[%s175_s0 + $0x10] sm:$0xff] }
   0x3   :  { %v27_v7 = vpack.c.bf16 %v22_v5, %v21_v4  ;;  %v20_v10 = vld [vmem:[%s175_s0 + $0x18] sm:$0xff]  ;;  %v17_v13 = vld [vmem:[%s175_s0] sm:$0xff]  ;;  %v18_v14 = vld [vmem:[%s175_s0 + $0x8] sm:$0xff] }
   0x4   :  { %v77_v6 = vsel %vm63_vm0, %v28_v3, 0  ;;  %v26_v11 = vpack.c.bf16 %v20_v10, %v19_v9  ;;  %v25_v15 = vpack.c.bf16 %v18_v14, %v17_v13  ;;  %v29_v17 = vld [vmem:[%s176_s2] sm:$0xff]  ;;  %v30_v18 = vld [vmem:[%s176_s2 + $0x8] sm:$0xff] }
   0x5   :  { %83 = vmatpush.bf16.xpose.msra.mxu0 %v77_v6  ;;  %v74_v8 = vsel %vm63_vm0, %v27_v7, 0  ;;  %38 = vperm.xlu1 %108, %v30_v18  }
   0x6   :  { %v71_v12 = vsel %vm63_vm0, %v26_v11, 0  ;;  %v68_v16 = vsel %vm63_vm0, %v25_v15, 0 }
   0xd   :  { %84 = vmatpush.bf16.xpose.msra.mxu0 %v74_v8 }
  0x15   :  { %85 = vmatpush.bf16.xpose.msra.mxu0 %v71_v12 }
  0x1d   :  { %86 = vmatpush.bf16.xpose.msra.mxu0 %v68_v16 }
  0x69   :  { %107 = vset.pattern.permute.xlu0 %v109_v19 }
  0x70   :  { %33 = vperm.xlu0 %107, %v29_v17  }
  0x77   :  { %v39_v24 = vpop.permute.xlu1 %38 }
  0xae   :  { %v55_v20 = vpop.trf.xlu0 }
  0xaf   :  { %104 = vmatmul.msk.bf16.vlgmr.msra.gmra.mxu0 %vm63_vm0, %v55_v20 }
  0xe2   :  { %v34_v21 = vpop.permute.xlu0 %33 }
 0x12c   :  { %v88_v22 = vpop.f32.mrf.mxu0 }
 0x12d   :  { %v89_v23 = vadd.f32 %v88_v22, %v34_v21 }
 0x12f   :  { %94 = vst.msk [vmem:[%s177_s3] sm:$0xff] %vm93_vm1, %v89_v23 }
 0x134   :  { %v90_v25 = vpop.f32.mrf.mxu0 }
 0x135   :  { %v91_v26 = vadd.f32 %v90_v25, %v39_v24 }
 0x137   :  { %95 = vst.msk [vmem:[%s177_s3 + $0x8] sm:$0xff] %vm93_vm1, %v91_v26 }

// kernel: _lambda_.6
= control target key start
LH: loop header
LB: loop body
LE: loop exit
PB: predicated region body
PF: predicated region fallthrough
CT: control target
= control target key end

     0   :  { %vm32_vm0 = vcmask 130048   ;;  %vm128_vm1 = vcmask 15360   ;;  %vm59_vm2 = vcmask 519168   ;;  %s254_s0 = inlined_call_operand.vmem [shape: f32[16,64], index: 0, kind: input, shape index: {}]   ;;  %s255_s2 = inlined_call_operand.vmem [shape: bf16[16,2], index: 2, kind: input, shape index: {}]   ;;  %s256_s1 = inlined_call_operand.vmem [shape: bf16[20,16], index: 1, kind: input, shape index: {}]   ;;  %s257_s5 = inlined_call_operand.vmem [shape: f32[64,2], index: 5, kind: output, shape index: {2}]   ;;  %s258_s3 = inlined_call_operand.vmem [shape: bf16[16,64], index: 3, kind: output, shape index: {0}]   ;;  %s259_s4 = inlined_call_operand.vmem [shape: f32[4,64], index: 4, kind: output, shape index: {1}]  }
   0x1   :  { %v18_v0 = vld [vmem:[%s254_s0] sm:$0xff]  ;;  %v19_v1 = vld [vmem:[%s254_s0 + $0x8] sm:$0xff] }
   0x2   :  { %v164_v2 = vld [vmem:[%s255_s2] sm:$0xff]  ;;  %v20_v3 = vpack.c.bf16 %v19_v1, %v18_v0  ;;  %v23_v5 = vld [vmem:[%s256_s1 + $0x8] sm:$0x3] }
   0x3   :  { %106 = vmatpush.bf16.msra.mxu1 %v164_v2  ;;  %166 = vmatpush.bf16.msra.mxu2 %v164_v2  ;;  %v163_v6 = vld [vmem:[%s256_s1] sm:$0xff]  ;;  %v29_v7 = vunpack.c.l.b16 %v23_v5 }
   0x4   :  { %65 = vxpose.xlu0.c.b16.start.end [1/1] (short) (narrow) %v20_v3, 64  ;;  %165 = vmatpush.bf16.msra.mxu3 %v20_v3 }
   0x5   :  { %46 = vmatpush.bf16.msra.mxu0 %v20_v3  ;;  %v31_v8 = vpack.c.b16 %v29_v7, %v29_v7 }
   0x7   :  { %154 = vmatmul.msk.bf16.vlgmr.msra.gmra.mxu3 %vm32_vm0, %v31_v8 }
   0x8   :  { %153 = vmatmul.msk.bf16.vlgmr.msra.gmra.mxu0 %vm32_vm0, %v163_v6 }
  0x85   :  { %v48_v13 = vpop.f32.mrf.mxu0 }
  0x86   :  { %v57_v15 = vpack.c.bf16 %v48_v13, %v48_v13 }
  0x88   :  { %60 = vst.msk [vmem:[%s258_s3] sm:$0xf] %vm59_vm2, %v57_v15 }
  0x8a   :  { %v53_v16 = vpop.f32.mrf.mxu3 }
  0x8b   :  { %62 = vst.msk [vmem:[%s259_s4] sm:$0xf] %vm59_vm2, %v53_v16 }
  0x8d   :  { %v50_v17 = vpop.f32.mrf.mxu0 }
  0x8e   :  { %v58_v19 = vpack.c.bf16 %v50_v17, %v50_v17 }
  0x90   :  { %61 = vst.msk [vmem:[%s258_s3 + $0x4] sm:$0xf] %vm59_vm2, %v58_v19 }
  0x92   :  { %v55_v20 = vpop.f32.mrf.mxu3 }
  0xb0   :  { %v73_v4 = vpop.trf.xlu0 }
  0xb1   :  { %159 = vmatmul.msk.bf16.vlgmr.msra.gmra.mxu1 %vm32_vm0, %v73_v4 }
  0xc0   :  { %v74_v9 = vpop.trf.xlu0 }
  0xc1   :  { %160 = vmatmul.msk.bf16.gmra.mxu1 %vm32_vm0, %v74_v9 }
  0xd0   :  { %v75_v10 = vpop.trf.xlu0 }
  0xd1   :  { %161 = vmatmul.msk.bf16.vlgmr.msra.gmra.mxu2 %vm32_vm0, %v75_v10 }
  0xe0   :  { %v76_v11 = vpop.trf.xlu0 }
  0xe1   :  { %162 = vmatmul.msk.bf16.gmra.mxu2 %vm32_vm0, %v76_v11 }
 0x12e   :  { %v108_v12 = vpop.f32.mrf.mxu1 }
 0x12f   :  { %129 = vst.msk [vmem:[%s257_s5] sm:$0xff] %vm128_vm1, %v108_v12 }
 0x136   :  { %v110_v14 = vpop.f32.mrf.mxu1 }
 0x137   :  { %130 = vst.msk [vmem:[%s257_s5 + $0x8] sm:$0xff] %vm128_vm1, %v110_v14 }
 0x13e   :  { %v113_v18 = vpop.f32.mrf.mxu1 }
 0x13f   :  { %131 = vst.msk [vmem:[%s257_s5 + $0x10] sm:$0xff] %vm128_vm1, %v113_v18 }
 0x146   :  { %v115_v21 = vpop.f32.mrf.mxu1 }
 0x147   :  { %132 = vst.msk [vmem:[%s257_s5 + $0x18] sm:$0xff] %vm128_vm1, %v115_v21 }
 0x154   :  { %v118_v22 = vpop.f32.mrf.mxu2 }
 0x155   :  { %133 = vst.msk [vmem:[%s257_s5 + $0x20] sm:$0xff] %vm128_vm1, %v118_v22 }
 0x15c   :  { %v120_v23 = vpop.f32.mrf.mxu2 }
 0x15d   :  { %134 = vst.msk [vmem:[%s257_s5 + $0x28] sm:$0xff] %vm128_vm1, %v120_v23 }
 0x164   :  { %v123_v24 = vpop.f32.mrf.mxu2 }
 0x165   :  { %135 = vst.msk [vmem:[%s257_s5 + $0x30] sm:$0xff] %vm128_vm1, %v123_v24 }
 0x16c   :  { %v125_v25 = vpop.f32.mrf.mxu2 }
 0x16d   :  { %136 = vst.msk [vmem:[%s257_s5 + $0x38] sm:$0xff] %vm128_vm1, %v125_v25 }

// kernel: _lambda_.8
= control target key start
LH: loop header
LB: loop body
LE: loop exit
PB: predicated region body
PF: predicated region fallthrough
CT: control target
= control target key end

     0   :  { %vm32_vm0 = vcmask 130048   ;;  %vm129_vm1 = vcmask 7168   ;;  %vm59_vm2 = vcmask 519168   ;;  %vm62_vm3 = vcmask 517120   ;;  %s255_s0 = inlined_call_operand.vmem [shape: f32[16,64], index: 0, kind: input, shape index: {}]   ;;  %s256_s2 = inlined_call_operand.vmem [shape: bf16[16,1], index: 2, kind: input, shape index: {}]   ;;  %s257_s1 = inlined_call_operand.vmem [shape: bf16[18,16], index: 1, kind: input, shape index: {}]   ;;  %s258_s5 = inlined_call_operand.vmem [shape: f32[64,1], index: 5, kind: output, shape index: {2}]   ;;  %s259_s3 = inlined_call_operand.vmem [shape: bf16[16,64], index: 3, kind: output, shape index: {0}]   ;;  %s260_s4 = inlined_call_operand.vmem [shape: f32[2,64], index: 4, kind: output, shape index: {1}]  }
   0x1   :  { %v18_v0 = vld [vmem:[%s255_s0] sm:$0xff]  ;;  %v19_v1 = vld [vmem:[%s255_s0 + $0x8] sm:$0xff] }
   0x2   :  { %v165_v2 = vld [vmem:[%s256_s2] sm:$0xff]  ;;  %v20_v3 = vpack.c.bf16 %v19_v1, %v18_v0  ;;  %v23_v5 = vld [vmem:[%s257_s1 + $0x8] sm:$0x1] }
   0x3   :  { %107 = vmatpush.bf16.msra.mxu1 %v165_v2  ;;  %167 = vmatpush.bf16.msra.mxu2 %v165_v2  ;;  %v164_v6 = vld [vmem:[%s257_s1] sm:$0xff]  ;;  %v29_v7 = vunpack.c.l.b16 %v23_v5 }
   0x4   :  { %66 = vxpose.xlu0.c.b16.start.end [1/1] (short) (narrow) %v20_v3, 64  ;;  %166 = vmatpush.bf16.msra.mxu3 %v20_v3 }
   0x5   :  { %46 = vmatpush.bf16.msra.mxu0 %v20_v3  ;;  %v31_v8 = vpack.c.b16 %v29_v7, %v29_v7 }
   0x7   :  { %155 = vmatmul.msk.bf16.vlgmr.msra.gmra.mxu3 %vm32_vm0, %v31_v8 }
   0x8   :  { %154 = vmatmul.msk.bf16.vlgmr.msra.gmra.mxu0 %vm32_vm0, %v164_v6 }
  0x85   :  { %v48_v13 = vpop.f32.mrf.mxu0 }
  0x86   :  { %v57_v15 = vpack.c.bf16 %v48_v13, %v48_v13 }
  0x88   :  { %60 = vst.msk [vmem:[%s259_s3] sm:$0xf] %vm59_vm2, %v57_v15 }
  0x8a   :  { %v53_v16 = vpop.f32.mrf.mxu3 }
  0x8b   :  { %63 = vst.msk [vmem:[%s260_s4] sm:$0x3] %vm62_vm3, %v53_v16 }
  0x8d   :  { %v50_v17 = vpop.f32.mrf.mxu0 }
  0x8e   :  { %v58_v19 = vpack.c.bf16 %v50_v17, %v50_v17 }
  0x90   :  { %61 = vst.msk [vmem:[%s259_s3 + $0x4] sm:$0xf] %vm59_vm2, %v58_v19 }
  0x92   :  { %v55_v20 = vpop.f32.mrf.mxu3 }
  0xb0   :  { %v74_v4 = vpop.trf.xlu0 }
  0xb1   :  { %160 = vmatmul.msk.bf16.vlgmr.msra.gmra.mxu1 %vm32_vm0, %v74_v4 }
  0xc0   :  { %v75_v9 = vpop.trf.xlu0 }
  0xc1   :  { %161 = vmatmul.msk.bf16.gmra.mxu1 %vm32_vm0, %v75_v9 }
  0xd0   :  { %v76_v10 = vpop.trf.xlu0 }
  0xd1   :  { %162 = vmatmul.msk.bf16.vlgmr.msra.gmra.mxu2 %vm32_vm0, %v76_v10 }
  0xe0   :  { %v77_v11 = vpop.trf.xlu0 }
  0xe1   :  { %163 = vmatmul.msk.bf16.gmra.mxu2 %vm32_vm0, %v77_v11 }
 0x12e   :  { %v109_v12 = vpop.f32.mrf.mxu1 }
 0x12f   :  { %130 = vst.msk [vmem:[%s258_s5] sm:$0xff] %vm129_vm1, %v109_v12 }
 0x136   :  { %v111_v14 = vpop.f32.mrf.mxu1 }
 0x137   :  { %131 = vst.msk [vmem:[%s258_s5 + $0x8] sm:$0xff] %vm129_vm1, %v111_v14 }
 0x13e   :  { %v114_v18 = vpop.f32.mrf.mxu1 }
 0x13f   :  { %132 = vst.msk [vmem:[%s258_s5 + $0x10] sm:$0xff] %vm129_vm1, %v114_v18 }
 0x146   :  { %v116_v21 = vpop.f32.mrf.mxu1 }
 0x147   :  { %133 = vst.msk [vmem:[%s258_s5 + $0x18] sm:$0xff] %vm129_vm1, %v116_v21 }
 0x154   :  { %v119_v22 = vpop.f32.mrf.mxu2 }
 0x155   :  { %134 = vst.msk [vmem:[%s258_s5 + $0x20] sm:$0xff] %vm129_vm1, %v119_v22 }
 0x15c   :  { %v121_v23 = vpop.f32.mrf.mxu2 }
 0x15d   :  { %135 = vst.msk [vmem:[%s258_s5 + $0x28] sm:$0xff] %vm129_vm1, %v121_v23 }
 0x164   :  { %v124_v24 = vpop.f32.mrf.mxu2 }
 0x165   :  { %136 = vst.msk [vmem:[%s258_s5 + $0x30] sm:$0xff] %vm129_vm1, %v124_v24 }
 0x16c   :  { %v126_v25 = vpop.f32.mrf.mxu2 }
 0x16d   :  { %137 = vst.msk [vmem:[%s258_s5 + $0x38] sm:$0xff] %vm129_vm1, %v126_v25 }

// kernel: _lambda_.7
= control target key start
LH: loop header
LB: loop body
LE: loop exit
PB: predicated region body
PF: predicated region fallthrough
CT: control target
= control target key end

     0   :  { %v525_v0 = vmov 0   ;;  %v526_v9 = vmov 1   ;;  %vm178_vm11 = vcmask 523264   ;;  %s824_s3 = inlined_call_operand.vmem [shape: f32[64,2], index: 3, kind: input, shape index: {}]   ;;  %s825_s2 = inlined_call_operand.vmem [shape: f32[4,64], index: 2, kind: input, shape index: {}]   ;;  %s826_s0 = inlined_call_operand.vmem [shape: s8[64,64], index: 0, kind: input, shape index: {}]   ;;  %s827_s5 = inlined_call_operand.vmem [shape: f32[16,1], index: 5, kind: input, shape index: {}]   ;;  %s828_s1 = inlined_call_operand.vmem [shape: bf16[16,64], index: 1, kind: input, shape index: {}]   ;;  %s829_s4 = inlined_call_operand.vmem [shape: f32[16,64], index: 4, kind: input, shape index: {}]   ;;  %s830_s6 = inlined_call_operand.vmem [shape: f32[16,64], index: 6, kind: output, shape index: {}]  }
   0x1   :  { %476 = vset.pattern.permute.xlu1 %v525_v0  ;;  %475 = vset.pattern.permute.xlu0 %v525_v0  ;;  %v32_v1 = vld [vmem:[%s824_s3 + $0x10] sm:$0xff]  ;;  %v30_v2 = vld [vmem:[%s824_s3] sm:$0xff]  ;;  %v33_v4 = vld [vmem:[%s824_s3 + $0x18] sm:$0xff] }
   0x2   :  { %51 = vperm.xlu1 %476, %v32_v1   ;;  %41 = vperm.xlu0 %475, %v30_v2   ;;  %v34_v3 = vld [vmem:[%s824_s3 + $0x20] sm:$0xff]  ;;  %v31_v5 = vld [vmem:[%s824_s3 + $0x8] sm:$0xff]  ;;  %v37_v7 = vld [vmem:[%s824_s3 + $0x38] sm:$0xff] }
   0x3   :  { %477 = vset.pattern.permute.xlu2 %v525_v0  ;;  %v35_v6 = vld [vmem:[%s824_s3 + $0x28] sm:$0xff]  ;;  %v36_v8 = vld [vmem:[%s824_s3 + $0x30] sm:$0xff]  ;;  %v26_v12 = vld [vmem:[%s826_s0] sm:$0xff] }
   0x4   :  { %61 = vperm.xlu2 %477, %v34_v3   ;;  %v27_v10 = vld [vmem:[%s826_s0 + $0x8] sm:$0xff]  ;;  %vm28_vm1 = vnez %v26_v12  ;;  %v603_v41 = vld [vmem:[%s825_s2 + $0x2] ss:$0 sm:$0xff] }
   0x5   :  { %vm29_vm0 = vnez %v27_v10  ;;  %v112_v15 = vsel %vm28_vm1, 16843009, %v525_v0 }
   0x6   :  { %v113_v11 = vsel %vm29_vm0, 16843009, %v525_v0  ;;  %v116_v18 = vunpack.c.2.s8 %v112_v15  ;;  %v115_v19 = vunpack.c.1.s8 %v112_v15  ;;  %v114_v21 = vunpack.c.0.s8 %v112_v15 }
   0x7   :  { %v118_v14 = vunpack.c.0.s8 %v113_v11  ;;  %v119_v17 = vunpack.c.1.s8 %v113_v11  ;;  %v117_v24 = vunpack.c.3.s8 %v112_v15  ;;  %v121_v27 = vunpack.c.3.s8 %v113_v11 }
   0x8   :  { %v126_v25 = vpack.c.b16 %v116_v18, %v116_v18  ;;  %v124_v26 = vpack.c.b16 %v115_v19, %v115_v19  ;;  %v120_v28 = vunpack.c.2.s8 %v113_v11  ;;  %v122_v29 = vpack.c.b16 %v114_v21, %v114_v21 }
   0x9   :  { %v130_v16 = vpack.c.b16 %v118_v14, %v118_v14  ;;  %v132_v23 = vpack.c.b16 %v119_v17, %v119_v17  ;;  %v128_v31 = vpack.c.b16 %v117_v24, %v117_v24  ;;  %v136_v34 = vpack.c.b16 %v121_v27, %v121_v27 }
   0xa   :  { %56 = vperm.xlu1 %476, %v33_v4   ;;  %46 = vperm.xlu0 %475, %v31_v5   ;;  %v127_v32 = vpack.c.b8 %v126_v25, %v126_v25  ;;  %v125_v33 = vpack.c.b8 %v124_v26, %v124_v26  ;;  %v134_v36 = vpack.c.b16 %v120_v28, %v120_v28 }
   0xb   :  { %v131_v20 = vpack.c.b8 %v130_v16, %v130_v16  ;;  %v133_v30 = vpack.c.b8 %v132_v23, %v132_v23  ;;  %v123_v39 = vpack.c.b8 %v122_v29, %v122_v29  ;;  %v129_v40 = vpack.c.b8 %v128_v31, %v128_v31 }
   0xc   :  { %66 = vperm.xlu2 %477, %v35_v6   ;;  %vm140_vm4 = vnez %v127_v32  ;;  %vm139_vm5 = vnez %v125_v33  ;;  %v137_v43 = vpack.c.b8 %v136_v34, %v136_v34  ;;  %v135_v45 = vpack.c.b8 %v134_v36, %v134_v36  ;;  %v669_v32 = vld [vmem:[%s825_s2 + $0x3] ss:$0 sm:$0xff] }
   0xd   :  { %vm142_vm2 = vnez %v131_v20  ;;  %vm143_vm3 = vnez %v133_v30  ;;  %vm138_vm6 = vnez %v123_v39  ;;  %v148_v48 = vsel %vm140_vm4, 16843009, %v525_v0 }
   0xe   :  { %v150_v35 = vsel %vm142_vm2, 16843009, %v525_v0  ;;  %v151_v47 = vsel %vm143_vm3, 16843009, %v525_v0  ;;  %vm141_vm7 = vnez %v129_v40  ;;  %v147_v49 = vsel %vm139_vm5, 16843009, %v525_v0 }
   0xf   :  { %v158_v42 = vunpack.c.0.s8 %v150_v35  ;;  %vm145_vm9 = vnez %v137_v43  ;;  %v159_v52 = vunpack.c.0.s8 %v151_v47  ;;  %v146_v54 = vsel %vm138_vm6, 16843009, %v525_v0 }
  0x10   :  { %vm144_vm10 = vnez %v135_v45  ;;  %v156_v56 = vunpack.c.0.s8 %v148_v48  ;;  %v149_v58 = vsel %vm141_vm7, 16843009, %v525_v0  ;;  %v155_v60 = vunpack.c.0.s8 %v147_v49 }
  0x11   :  { %vm611_vm8 = vcmp.ne.s32.totalorder %v158_v42, 0  ;;  %vm628_vm1 = vcmp.ne.s32.totalorder %v159_v52, 0 }
  0x12   :  { %76 = vperm.xlu1 %476, %v37_v7   ;;  %71 = vperm.xlu0 %475, %v36_v8   ;;  %vm624_vm0 = vcmp.ne.s32.totalorder %v155_v60, 0  ;;  %vm644_vm5 = vcmp.ne.s32.totalorder %v156_v56, 0 }
  0x14   :  { %478 = vset.pattern.permute.xlu2 %v526_v9 }
  0x15   :  { %271 = vperm.xlu2 %478, %v30_v2  }
  0x1a   :  { %480 = vset.pattern.permute.xlu1 %v526_v9  ;;  %479 = vset.pattern.permute.xlu0 %v526_v9 }
  0x1b   :  { %279 = vperm.xlu1 %480, %v32_v1   ;;  %275 = vperm.xlu0 %479, %v31_v5   ;;  %v153_v1 = vsel %vm145_vm9, 16843009, %v525_v0 }
  0x1c   :  { %v161_v9 = vunpack.c.0.s8 %v153_v1 }
  0x1d   :  { %283 = vperm.xlu2 %478, %v33_v4   ;;  %v152_v4 = vsel %vm144_vm10, 16843009, %v525_v0 }
  0x1e   :  { %vm652_vm7 = vcmp.ne.s32.totalorder %v161_v9, 0 }
  0x23   :  { %287 = vperm.xlu1 %480, %v34_v3   ;;  %295 = vperm.xlu0 %479, %v36_v8   ;;  %v154_v3 = vunpack.c.0.s8 %v146_v54 }
  0x25   :  { %291 = vperm.xlu2 %478, %v35_v6   ;;  %v157_v6 = vunpack.c.0.s8 %v149_v58  ;;  %vm632_vm4 = vcmp.ne.s32.totalorder %v154_v3, 0 }
  0x27   :  { %vm648_vm6 = vcmp.ne.s32.totalorder %v157_v6, 0 }
  0x2b   :  { %299 = vperm.xlu1 %480, %v37_v7   ;;  %482 = vset.pattern.permute.xlu0 %v525_v0 }
  0x2d   :  { %481 = vset.pattern.permute.xlu2 %v525_v0  ;;  %v160_v0 = vunpack.c.0.s8 %v152_v4 }
  0x2f   :  { %vm673_vm9 = vcmp.ne.s32.totalorder %v160_v0, 0 }
  0x5e   :  { %v62_v13 = vpop.permute.xlu2 %61 }
  0x5f   :  { %v84_v46 = vadd.f32 %v603_v41, %v62_v13 }
  0x61   :  { %v100_v55 = vmul.f32 0.2, %v84_v46  ;;  %vm92_vm12 = vcmp.gt.f32.partialorder %v84_v46, 0.0 }
  0x63   :  { %v108_v10 = vsel %vm92_vm12, %v84_v46, %v100_v55 }
  0x64   :  { %v642_v20 = vsel %vm611_vm8, %v108_v10, -1e+30 }
  0x66   :  { %v67_v22 = vpop.permute.xlu2 %66 }
  0x67   :  { %v85_v51 = vadd.f32 %v603_v41, %v67_v22 }
  0x69   :  { %v101_v2 = vmul.f32 0.2, %v85_v51  ;;  %vm93_vm14 = vcmp.gt.f32.partialorder %v85_v51, 0.0 }
  0x6b   :  { %v109_v16 = vsel %vm93_vm14, %v85_v51, %v101_v2 }
  0x6c   :  { %v660_v30 = vsel %vm628_vm1, %v109_v16, -1e+30 }
  0x6d   :  { %v185_v40 = vsel %vm178_vm11, %v660_v30, -inf }
  0x6f   :  { %v605_v44 = vpop.permute.xlu2 %271 }
  0x70   :  { %v303_v55 = vadd.f32 %v669_v32, %v605_v44 }
  0x72   :  { %v319_v3 = vmul.f32 0.2, %v303_v55 }
  0x74   :  { %v52_v37 = vpop.permute.xlu1 %51  ;;  %v42_v38 = vpop.permute.xlu0 %41 }
  0x75   :  { %v80_v53 = vadd.f32 %v603_v41, %v42_v38  ;;  %v82_v61 = vadd.f32 %v603_v41, %v52_v37  ;;  %v183_v37 = vsel %vm178_vm11, %v642_v20, -inf }
  0x77   :  { %v96_v5 = vmul.f32 0.2, %v80_v53  ;;  %vm88_vm15 = vcmp.gt.f32.partialorder %v80_v53, 0.0  ;;  %v98_v11 = vmul.f32 0.2, %v82_v61  ;;  %v284_v14 = vpop.permute.xlu2 %283  ;;  %vm90_vm2 = vcmp.gt.f32.partialorder %v82_v61, 0.0 }
  0x78   :  { %v306_v58 = vadd.f32 %v669_v32, %v284_v14 }
  0x79   :  { %v104_v17 = vsel %vm88_vm15, %v80_v53, %v96_v5  ;;  %v106_v26 = vsel %vm90_vm2, %v82_v61, %v98_v11 }
  0x7a   :  { %v664_v31 = vsel %vm632_vm4, %v104_v17, -1e+30  ;;  %v681_v38 = vsel %vm644_vm5, %v106_v26, -1e+30  ;;  %v322_v5 = vmul.f32 0.2, %v306_v58 }
  0x7b   :  { %v181_v48 = vsel %vm178_vm11, %v681_v38, -inf  ;;  %vm314_vm14 = vcmp.gt.f32.partialorder %v306_v58, 0.0 }
  0x7c   :  { %v57_v57 = vpop.permute.xlu1 %56  ;;  %v47_v59 = vpop.permute.xlu0 %46 }
  0x7d   :  { %v83_v62 = vadd.f32 %v603_v41, %v57_v57  ;;  %v81_v63 = vadd.f32 %v603_v41, %v47_v59 }
  0x7f   :  { %vm89_vm13 = vcmp.gt.f32.partialorder %v81_v63, 0.0  ;;  %v97_v7 = vmul.f32 0.2, %v81_v63  ;;  %v99_v12 = vmul.f32 0.2, %v83_v62  ;;  %vm91_vm3 = vcmp.gt.f32.partialorder %v83_v62, 0.0  ;;  %v292_v53 = vpop.permute.xlu2 %291 }
  0x81   :  { %v105_v13 = vsel %vm89_vm13, %v81_v63, %v97_v7  ;;  %v107_v27 = vsel %vm91_vm3, %v83_v62, %v99_v12  ;;  %v308_v63 = vadd.f32 %v669_v32, %v292_v53  ;;  %vm311_vm13 = vcmp.gt.f32.partialorder %v303_v55, 0.0 }
  0x82   :  { %v638_v19 = vsel %vm624_vm0, %v105_v13, -1e+30  ;;  %v685_v39 = vsel %vm648_vm6, %v107_v27, -1e+30  ;;  %v327_v10 = vsel %vm311_vm13, %v303_v55, %v319_v3  ;;  %v330_v12 = vsel %vm314_vm14, %v306_v58, %v322_v5 }
  0x83   :  { %v180_v33 = vsel %vm178_vm11, %v638_v19, -inf  ;;  %v182_v49 = vsel %vm178_vm11, %v685_v39, -inf  ;;  %v324_v6 = vmul.f32 0.2, %v308_v63  ;;  %vm316_vm15 = vcmp.gt.f32.partialorder %v308_v63, 0.0 }
  0x84   :  { %v77_v23 = vpop.permute.xlu1 %76  ;;  %v72_v25 = vpop.permute.xlu0 %71  ;;  %v186_v45 = vmax.f32 %v180_v33, %v185_v40  ;;  %v721_v33 = vsel %vm648_vm6, %v330_v12, -1e+30 }
  0x85   :  { %v87_v28 = vadd.f32 %v603_v41, %v77_v23  ;;  %v86_v29 = vadd.f32 %v603_v41, %v72_v25  ;;  %v179_v41 = vsel %vm178_vm11, %v664_v31, -inf  ;;  %v332_v16 = vsel %vm316_vm15, %v308_v63, %v324_v6 }
  0x86   :  { %v184_v54 = vmax.f32 %v179_v41, %v183_v37  ;;  %v717_v25 = vsel %vm632_vm4, %v327_v10, -1e+30  ;;  %v346_v21 = vsel %vm178_vm11, %v721_v33, -inf }
  0x87   :  { %vm95_vm10 = vcmp.gt.f32.partialorder %v87_v28, 0.0  ;;  %v103_v35 = vmul.f32 0.2, %v87_v28  ;;  %vm94_vm12 = vcmp.gt.f32.partialorder %v86_v29, 0.0  ;;  %v102_v36 = vmul.f32 0.2, %v86_v29 }
  0x88   :  { %v191_v61 = vmax.f32 %v184_v54, %v186_v45  ;;  %v343_v15 = vsel %vm178_vm11, %v717_v25, -inf }
  0x89   :  { %v111_v42 = vsel %vm95_vm10, %v87_v28, %v103_v35  ;;  %v110_v43 = vsel %vm94_vm12, %v86_v29, %v102_v36  ;;  %v725_v35 = vsel %vm628_vm1, %v332_v16, -1e+30 }
  0x8a   :  { %v693_v46 = vsel %vm652_vm7, %v111_v42, -1e+30  ;;  %v697_v47 = vsel %vm673_vm9, %v110_v43, -1e+30  ;;  %v349_v8 = vsel %vm178_vm11, %v725_v35, -inf }
  0x8b   :  { %v189_v51 = vsel %vm178_vm11, %v693_v46, -inf  ;;  %v187_v52 = vsel %vm178_vm11, %v697_v47, -inf }
  0x8c   :  { %v190_v56 = vmax.f32 %v182_v49, %v189_v51  ;;  %v188_v57 = vmax.f32 %v181_v48, %v187_v52 }
  0x8d   :  { %v280_v59 = vpop.permute.xlu1 %279  ;;  %v276_v60 = vpop.permute.xlu0 %275 }
  0x8e   :  { %v192_v62 = vmax.f32 %v188_v57, %v190_v56  ;;  %v305_v1 = vadd.f32 %v669_v32, %v280_v59  ;;  %v304_v2 = vadd.f32 %v669_v32, %v276_v60 }
  0x90   :  { %v193_v4 = vmax.f32 %v191_v61, %v192_v62  ;;  %v321_v7 = vmul.f32 0.2, %v305_v1  ;;  %v320_v9 = vmul.f32 0.2, %v304_v2  ;;  %vm313_vm2 = vcmp.gt.f32.partialorder %v305_v1, 0.0 }
  0x91   :  { %vm312_vm3 = vcmp.gt.f32.partialorder %v304_v2, 0.0 }
  0x92   :  { %v194_v44 = vrot.slane %v193_v4, 4  ;;  %v329_v26 = vsel %vm313_vm2, %v305_v1, %v321_v7  ;;  %v328_v27 = vsel %vm312_vm3, %v304_v2, %v320_v9 }
  0x93   :  { %v729_v18 = vsel %vm644_vm5, %v329_v26, -1e+30  ;;  %v733_v40 = vsel %vm624_vm0, %v328_v27, -1e+30 }
  0x94   :  { %v195_v11 = vmax.f32 %v193_v4, %v194_v44  ;;  %v345_v48 = vsel %vm178_vm11, %v729_v18, -inf  ;;  %v344_v50 = vsel %vm178_vm11, %v733_v40, -inf }
  0x95   :  { %v288_v13 = vpop.permute.xlu1 %287  ;;  %v296_v14 = vpop.permute.xlu0 %295 }
  0x96   :  { %v196_v0 = vrot.slane %v195_v11, 2  ;;  %v307_v17 = vadd.f32 %v669_v32, %v288_v13  ;;  %v309_v23 = vadd.f32 %v669_v32, %v296_v14 }
  0x98   :  { %v197_v28 = vmax.f32 %v195_v11, %v196_v0  ;;  %vm315_vm10 = vcmp.gt.f32.partialorder %v307_v17, 0.0  ;;  %v323_v29 = vmul.f32 0.2, %v307_v17  ;;  %vm317_vm12 = vcmp.gt.f32.partialorder %v309_v23, 0.0 }
  0x99   :  { %v325_v36 = vmul.f32 0.2, %v309_v23 }
  0x9a   :  { %v198_v37 = vrot.slane %v197_v28, 1  ;;  %v331_v41 = vsel %vm315_vm10, %v307_v17, %v323_v29 }
  0x9b   :  { %v737_v22 = vsel %vm611_vm8, %v331_v41, -1e+30  ;;  %v333_v42 = vsel %vm317_vm12, %v309_v23, %v325_v36 }
  0x9c   :  { %v199_v43 = vmax.f32 %v197_v28, %v198_v37  ;;  %v347_v45 = vsel %vm178_vm11, %v737_v22, -inf  ;;  %v754_v52 = vsel %vm673_vm9, %v333_v42, -1e+30 }
  0x9d   :  { %v300_v49 = vpop.permute.xlu1 %299  ;;  %v348_v55 = vmax.f32 %v343_v15, %v347_v45  ;;  %v433_v45 = vld [vmem:[%s827_s5] sm:$0xff] }
  0x9e   :  { %v206_v51 = vsub.f32 %v697_v47, %v199_v43  ;;  %v310_v53 = vadd.f32 %v669_v32, %v300_v49  ;;  %v207_v54 = vsub.f32 %v693_v46, %v199_v43  ;;  %v204_v56 = vsub.f32 %v642_v20, %v199_v43  ;;  %437 = vperm.xlu2 %481, %v433_v45  }
  0x9f   :  { %v205_v57 = vsub.f32 %v660_v30, %v199_v43  ;;  %v202_v58 = vsub.f32 %v681_v38, %v199_v43  ;;  %v203_v47 = vsub.f32 %v685_v39, %v199_v43  ;;  %v200_v63 = vsub.f32 %v664_v31, %v199_v43 }
  0xa0   :  { %vm318_vm8 = vcmp.gt.f32.partialorder %v310_v53, 0.0  ;;  %v326_v59 = vmul.f32 0.2, %v310_v53  ;;  %v220_v60 = vmul.f32 1.442695, %v206_v51  ;;  %v351_v32 = vsel %vm178_vm11, %v754_v52, -inf }
  0xa1   :  { %v222_v61 = vmul.f32 1.442695, %v207_v54  ;;  %v216_v34 = vmul.f32 1.442695, %v204_v56  ;;  %v218_v62 = vmul.f32 1.442695, %v205_v57  ;;  %v201_v1 = vsub.f32 %v638_v19, %v199_v43 }
  0xa2   :  { %v334_v46 = vsel %vm318_vm8, %v310_v53, %v326_v59  ;;  %485 = vpow2.f32 %v220_v60  ;;  %v212_v20 = vmul.f32 1.442695, %v202_v58  ;;  %v214_v38 = vmul.f32 1.442695, %v203_v47  ;;  %v246_v56 = vld [vmem:[%s828_s1] sm:$0xf] }
  0xa3   :  { %v767_v30 = vsel %vm652_vm7, %v334_v46, -1e+30  ;;  %487 = vpow2.f32 %v222_v61  ;;  %v350_v39 = vmax.f32 %v344_v50, %v349_v8  ;;  %v208_v31 = vmul.f32 1.442695, %v200_v63 }
  0xa4   :  { %v353_v2 = vsel %vm178_vm11, %v767_v30, -inf  ;;  %489 = vpow2.f32 %v216_v34  ;;  %v352_v3 = vmax.f32 %v345_v48, %v351_v32  ;;  %v210_v5 = vmul.f32 1.442695, %v201_v1 }
  0xa5   :  { %v354_v4 = vmax.f32 %v346_v21, %v353_v2  ;;  %491 = vpow2.f32 %v218_v62  ;;  %v355_v44 = vmax.f32 %v348_v55, %v350_v39  ;;  %v434_v21 = vld [vmem:[%s827_s5 + $0x8] sm:$0xff] }
  0xa6   :  { %493 = vpow2.f32 %v212_v20  ;;  %442 = vperm.xlu0 %482, %v434_v21  }
  0xa7   :  { %v356_v6 = vmax.f32 %v352_v3, %v354_v4  ;;  %495 = vpow2.f32 %v214_v38 }
  0xa8   :  { %v486_v24 = vpop.eup %485  ;;  %497 = vpow2.f32 %v208_v31 }
  0xa9   :  { %v488_v7 = vpop.eup %487  ;;  %v357_v9 = vmax.f32 %v355_v44, %v356_v6  ;;  %499 = vpow2.f32 %v210_v5 }
  0xaa   :  { %v490_v19 = vpop.eup %489  ;;  %v250_v10 = vpack.c.bf16 %v488_v7, %v486_v24  ;;  %v237_v46 = vsel %vm178_vm11, %v488_v7, 0.0 }
  0xab   :  { %v492_v11 = vpop.eup %491  ;;  %v358_v12 = vrot.slane %v357_v9, 4  ;;  %v231_v55 = vsel %vm178_vm11, %v490_v19, 0.0 }
  0xac   :  { %v494_v13 = vpop.eup %493  ;;  %258 = vmatpush.bf16.msra.mxu0 %v250_v10  ;;  %v249_v17 = vpack.c.bf16 %v492_v11, %v490_v19 }
  0xad   :  { %v496_v14 = vpop.eup %495  ;;  %v359_v0 = vmax.f32 %v357_v9, %v358_v12  ;;  %v227_v37 = vsel %vm178_vm11, %v494_v13, 0.0 }
  0xae   :  { %v498_v16 = vpop.eup %497  ;;  %v248_v41 = vpack.c.bf16 %v496_v14, %v494_v13  ;;  %v229_v43 = vsel %vm178_vm11, %v496_v14, 0.0 }
  0xaf   :  { %v500_v23 = vpop.eup %499  ;;  %v360_v26 = vrot.slane %v359_v0, 2  ;;  %v224_v27 = vsel %vm178_vm11, %v498_v16, 0.0 }
  0xb0   :  { %259 = vmatpush.bf16.msra.mxu0 %v249_v17  ;;  %v225_v28 = vsel %vm178_vm11, %v500_v23, 0.0  ;;  %v247_v50 = vpack.c.bf16 %v500_v23, %v498_v16  ;;  %v410_v17 = vld [vmem:[%s828_s1 + $0x4] sm:$0xf] }
  0xb1   :  { %v361_v29 = vmax.f32 %v359_v0, %v360_v26  ;;  %v226_v36 = vadd.f32 %v225_v28, %v224_v27 }
  0xb3   :  { %v362_v42 = vrot.slane %v361_v29, 1  ;;  %v228_v15 = vadd.f32 %v227_v37, %v226_v36 }
  0xb4   :  { %260 = vmatpush.bf16.msra.mxu0 %v248_v41 }
  0xb5   :  { %v363_v8 = vmax.f32 %v361_v29, %v362_v42  ;;  %v230_v48 = vadd.f32 %v229_v43, %v228_v15 }
  0xb7   :  { %v371_v49 = vsub.f32 %v767_v30, %v363_v8  ;;  %v370_v51 = vsub.f32 %v754_v52, %v363_v8  ;;  %v368_v53 = vsub.f32 %v737_v22, %v363_v8  ;;  %v369_v54 = vsub.f32 %v725_v35, %v363_v8 }
  0xb8   :  { %261 = vmatpush.bf16.msra.mxu0 %v247_v50  ;;  %v366_v57 = vsub.f32 %v729_v18, %v363_v8  ;;  %v367_v58 = vsub.f32 %v721_v33, %v363_v8  ;;  %v364_v59 = vsub.f32 %v717_v25, %v363_v8  ;;  %v232_v61 = vadd.f32 %v231_v55, %v230_v48 }
  0xb9   :  { %v384_v60 = vmul.f32 1.442695, %v370_v51  ;;  %v386_v47 = vmul.f32 1.442695, %v371_v49  ;;  %v380_v52 = vmul.f32 1.442695, %v368_v53  ;;  %v365_v34 = vsub.f32 %v733_v40, %v363_v8 }
  0xba   :  { %v233_v22 = vsel %vm178_vm11, %v492_v11, 0.0  ;;  %v382_v35 = vmul.f32 1.442695, %v369_v54  ;;  %v376_v62 = vmul.f32 1.442695, %v366_v57  ;;  %v235_v18 = vsel %vm178_vm11, %v486_v24, 0.0 }
  0xbb   :  { %469 = vmatmul.msk.bf16.vlgmr.msra.gmra.mxu0 %vm178_vm11, %v246_v56  ;;  %501 = vpow2.f32 %v384_v60  ;;  %v234_v63 = vadd.f32 %v233_v22, %v232_v61  ;;  %v378_v33 = vmul.f32 1.442695, %v367_v58  ;;  %v372_v25 = vmul.f32 1.442695, %v364_v59  ;;  %v459_v61 = vld [vmem:[%s829_s4] sm:$0xff] }
  0xbc   :  { %503 = vpow2.f32 %v386_v47  ;;  %v374_v20 = vmul.f32 1.442695, %v365_v34 }
  0xbd   :  { %505 = vpow2.f32 %v380_v52  ;;  %v236_v32 = vadd.f32 %v235_v18, %v234_v63 }
  0xbe   :  { %507 = vpow2.f32 %v382_v35 }
  0xbf   :  { %509 = vpow2.f32 %v376_v62  ;;  %v238_v30 = vadd.f32 %v237_v46, %v236_v32 }
  0xc0   :  { %511 = vpow2.f32 %v378_v33 }
  0xc1   :  { %v502_v40 = vpop.eup %501  ;;  %513 = vpow2.f32 %v372_v25  ;;  %v239_v36 = vrot.slane %v238_v30, 4 }
  0xc2   :  { %v504_v38 = vpop.eup %503  ;;  %515 = vpow2.f32 %v374_v20  ;;  %v399_v26 = vsel %vm178_vm11, %v502_v40, 0.0 }
  0xc3   :  { %v506_v1 = vpop.eup %505  ;;  %v414_v39 = vpack.c.bf16 %v504_v38, %v502_v40  ;;  %v401_v28 = vsel %vm178_vm11, %v504_v38, 0.0  ;;  %v240_v37 = vadd.f32 %v239_v36, %v238_v30  ;;  %v460_v40 = vld [vmem:[%s829_s4 + $0x8] sm:$0xff] }
  0xc4   :  { %v508_v2 = vpop.eup %507  ;;  %v395_v13 = vsel %vm178_vm11, %v506_v1, 0.0 }
  0xc5   :  { %v510_v31 = vpop.eup %509  ;;  %422 = vmatpush.bf16.msra.mxu1 %v414_v39  ;;  %v413_v5 = vpack.c.bf16 %v508_v2, %v506_v1  ;;  %v397_v16 = vsel %vm178_vm11, %v508_v2, 0.0  ;;  %v241_v41 = vrot.slane %v240_v37, 2 }
  0xc6   :  { %v512_v3 = vpop.eup %511  ;;  %v391_v9 = vsel %vm178_vm11, %v510_v31, 0.0 }
  0xc7   :  { %v514_v4 = vpop.eup %513  ;;  %v412_v19 = vpack.c.bf16 %v512_v3, %v510_v31  ;;  %v393_v11 = vsel %vm178_vm11, %v512_v3, 0.0  ;;  %v242_v42 = vadd.f32 %v241_v41, %v240_v37 }
  0xc8   :  { %v516_v44 = vpop.eup %515  ;;  %v388_v6 = vsel %vm178_vm11, %v514_v4, 0.0 }
  0xc9   :  { %423 = vmatpush.bf16.msra.mxu1 %v413_v5  ;;  %v389_v24 = vsel %vm178_vm11, %v516_v44, 0.0  ;;  %v411_v14 = vpack.c.bf16 %v516_v44, %v514_v4  ;;  %v243_v15 = vrot.slane %v242_v42, 1 }
  0xca   :  { %v390_v7 = vadd.f32 %v389_v24, %v388_v6 }
  0xcb   :  { %v244_v43 = vadd.f32 %v243_v15, %v242_v42 }
  0xcc   :  { %v392_v10 = vadd.f32 %v391_v9, %v390_v7 }
  0xcd   :  { %424 = vmatpush.bf16.msra.mxu1 %v412_v19  ;;  %v245_v45 = vmax.f32 %v244_v43, 1e-09 }
  0xce   :  { %v394_v12 = vadd.f32 %v393_v11, %v392_v10 }
  0xcf   :  { %517 = vrcp.f32 %v245_v45 }
  0xd0   :  { %v396_v0 = vadd.f32 %v395_v13, %v394_v12 }
  0xd1   :  { %425 = vmatpush.bf16.msra.mxu1 %v411_v14 }
  0xd2   :  { %v398_v23 = vadd.f32 %v397_v16, %v396_v0 }
  0xd4   :  { %470 = vmatmul.msk.bf16.vlgmr.msra.gmra.mxu1 %vm178_vm11, %v410_v17  ;;  %v400_v27 = vadd.f32 %v399_v26, %v398_v23 }
  0xd5   :  { %v518_v50 = vpop.eup %517 }
  0xd6   :  { %v402_v29 = vadd.f32 %v401_v28, %v400_v27 }
  0xd8   :  { %v403_v21 = vrot.slane %v402_v29, 4 }
  0xda   :  { %v404_v8 = vadd.f32 %v403_v21, %v402_v29 }
  0xdc   :  { %v405_v48 = vrot.slane %v404_v8, 2 }
  0xde   :  { %v406_v55 = vadd.f32 %v405_v48, %v404_v8 }
  0xe0   :  { %v407_v58 = vrot.slane %v406_v55, 1 }
  0xe2   :  { %v408_v60 = vadd.f32 %v407_v58, %v406_v55 }
  0xe4   :  { %v409_v52 = vmax.f32 %v408_v60, 1e-09 }
  0xf8   :  { %v438_v51 = vpop.permute.xlu2 %437 }
 0x118   :  { %v443_v18 = vpop.permute.xlu0 %442 }
 0x138   :  { %v263_v49 = vpop.f32.mrf.mxu0 }
 0x139   :  { %v268_v53 = vmul.f32 %v518_v50, %v263_v49 }
 0x13b   :  { %v445_v54 = vadd.f32 %v438_v51, %v268_v53 }
 0x13d   :  { %v449_v56 = vmin.f32 %v445_v54, 0.0  ;;  %vm447_vm0 = vcmp.gt.f32.partialorder %v445_v54, 0.0 }
 0x13f   :  { %v451_v57 = vmul.f32 1.442695, %v449_v56 }
 0x140   :  { %v265_v59 = vpop.f32.mrf.mxu0 }
 0x141   :  { %519 = vpow2.f32 %v451_v57 }
 0x142   :  { %521 = vrcp.f32 %v409_v52 }
 0x147   :  { %v520_v47 = vpop.eup %519 }
 0x148   :  { %v471_v22 = vadd.f32 -1.0, %v520_v47  ;;  %v522_v62 = vpop.eup %521 }
 0x14a   :  { %v457_v35 = vsel %vm447_vm0, %v445_v54, %v471_v22 }
 0x14b   :  { %v461_v34 = vadd.f32 %v459_v61, %v457_v35 }
 0x14d   :  { %463 = vst.msk [vmem:[%s830_s6] sm:$0xff] %vm178_vm11, %v461_v34 }
 0x151   :  { %v427_v63 = vpop.f32.mrf.mxu1 }
 0x152   :  { %v432_v33 = vmul.f32 %v522_v62, %v427_v63 }
 0x154   :  { %v446_v25 = vadd.f32 %v443_v18, %v432_v33 }
 0x156   :  { %v450_v32 = vmin.f32 %v446_v25, 0.0  ;;  %vm448_vm1 = vcmp.gt.f32.partialorder %v446_v25, 0.0 }
 0x158   :  { %v453_v46 = vmul.f32 1.442695, %v450_v32 }
 0x159   :  { %v429_v20 = vpop.f32.mrf.mxu1 }
 0x15a   :  { %523 = vpow2.f32 %v453_v46 }
 0x160   :  { %v524_v30 = vpop.eup %523 }
 0x161   :  { %v472_v38 = vadd.f32 -1.0, %v524_v30 }
 0x163   :  { %v458_v1 = vsel %vm448_vm1, %v446_v25, %v472_v38 }
 0x164   :  { %v462_v39 = vadd.f32 %v460_v40, %v458_v1 }
 0x166   :  { %464 = vst.msk [vmem:[%s830_s6 + $0x8] sm:$0xff] %vm178_vm11, %v462_v39 }

// kernel: _lambda_.9
= control target key start
LH: loop header
LB: loop body
LE: loop exit
PB: predicated region body
PF: predicated region fallthrough
CT: control target
= control target key end

     0   :  { %v392_v2 = vmov 0   ;;  %s558_s0 = inlined_call_operand.vmem [shape: s8[64,64], index: 0, kind: input, shape index: {}]   ;;  %s559_s1 = inlined_call_operand.vmem [shape: bf16[16,64], index: 1, kind: input, shape index: {}]   ;;  %s560_s2 = inlined_call_operand.vmem [shape: f32[2,64], index: 2, kind: input, shape index: {}]   ;;  %s561_s3 = inlined_call_operand.vmem [shape: f32[64,1], index: 3, kind: input, shape index: {}]   ;;  %s562_s4 = inlined_call_operand.vmem [shape: f32[16,64], index: 4, kind: input, shape index: {}]   ;;  %s563_s5 = inlined_call_operand.vmem [shape: f32[16,1], index: 5, kind: input, shape index: {}]   ;;  %s564_s6 = inlined_call_operand.hbm [shape: f32[16,64], index: 6, kind: output, shape index: {}]  }
   0x1   :  { %v33_v0 = vld [vmem:[%s561_s3 + $0x10] sm:$0xff]  ;;  %v31_v1 = vld [vmem:[%s561_s3] sm:$0xff]  ;;  %341 = vset.pattern.permute.xlu1 %v392_v2  ;;  %340 = vset.pattern.permute.xlu0 %v392_v2 }
   0x2   :  { %v35_v3 = vld [vmem:[%s561_s3 + $0x20] sm:$0xff]  ;;  %52 = vperm.xlu1 %341, %v33_v0   ;;  %42 = vperm.xlu0 %340, %v31_v1  }
   0x3   :  { %342 = vset.pattern.permute.xlu2 %v392_v2 }
   0x4   :  { %62 = vperm.xlu2 %342, %v35_v3  }
   0x5   :  { %11 = vsyncpa [#allocation3], 0  ;;  %v34_v4 = vld [vmem:[%s561_s3 + $0x18] sm:$0xff]  ;;  %v32_v5 = vld [vmem:[%s561_s3 + $0x8] sm:$0xff]  ;;  %vm179_vm11 = vcmask 523264   ;;  %s393_s22 = smov [#allocation2]  }
   0x6   :  { %v36_v6 = vld [vmem:[%s561_s3 + $0x28] sm:$0xff]  ;;  %v38_v7 = vld [vmem:[%s561_s3 + $0x38] sm:$0xff]  ;;  %v37_v8 = vld [vmem:[%s561_s3 + $0x30] sm:$0xff]  ;;  %s314_s23 = sshll.u32 %s393_s22, 4  ;;  %s316_s26 = sshll.u32 %s564_s6, 4  ;;  %s315_s23 = int_to_ptr.vmem [resolvable:$true] %s314_s23  ;;  %s317_s26 = int_to_ptr.hbm [resolvable:$true] %s316_s26 }
   0x7   :  { %v278_v9 = vld [vmem:[%s563_s5] sm:$0xff]  ;;  %v279_v10 = vld [vmem:[%s563_s5 + $0x8] sm:$0xff]  ;;  %s394_s29 = smov 128   ;;  %s395_s30 = smov 8  }
   0x8   :  { %v28_v11 = vld [vmem:[%s558_s0 + $0x8] sm:$0xff]  ;;  %v27_v13 = vld [vmem:[%s558_s0] sm:$0xff] }
   0x9   :  { %vm30_vm0 = vnez %v28_v11  ;;  %vm29_vm1 = vnez %v27_v13  ;;  %v476_v37 = vld [vmem:[%s560_s2 + $0x1] ss:$0 sm:$0xff] }
   0xa   :  { %57 = vperm.xlu1 %341, %v34_v4   ;;  %47 = vperm.xlu0 %340, %v32_v5   ;;  %v114_v12 = vsel %vm30_vm0, 16843009, %v392_v2  ;;  %v113_v15 = vsel %vm29_vm1, 16843009, %v392_v2 }
   0xb   :  { %v119_v14 = vunpack.c.0.s8 %v114_v12  ;;  %v120_v17 = vunpack.c.1.s8 %v114_v12  ;;  %v117_v18 = vunpack.c.2.s8 %v113_v15  ;;  %v116_v19 = vunpack.c.1.s8 %v113_v15 }
   0xc   :  { %67 = vperm.xlu2 %342, %v36_v6   ;;  %v115_v21 = vunpack.c.0.s8 %v113_v15  ;;  %v118_v23 = vunpack.c.3.s8 %v113_v15  ;;  %v122_v26 = vunpack.c.3.s8 %v114_v12  ;;  %v121_v28 = vunpack.c.2.s8 %v114_v12 }
   0xd   :  { %v131_v16 = vpack.c.b16 %v119_v14, %v119_v14  ;;  %v133_v22 = vpack.c.b16 %v120_v17, %v120_v17  ;;  %v127_v24 = vpack.c.b16 %v117_v18, %v117_v18  ;;  %v125_v25 = vpack.c.b16 %v116_v19, %v116_v19 }
   0xe   :  { %v123_v29 = vpack.c.b16 %v115_v21, %v115_v21  ;;  %v129_v31 = vpack.c.b16 %v118_v23, %v118_v23  ;;  %v137_v34 = vpack.c.b16 %v122_v26, %v122_v26  ;;  %v135_v36 = vpack.c.b16 %v121_v28, %v121_v28 }
   0xf   :  { %v132_v20 = vpack.c.b8 %v131_v16, %v131_v16  ;;  %v134_v30 = vpack.c.b8 %v133_v22, %v133_v22  ;;  %v128_v32 = vpack.c.b8 %v127_v24, %v127_v24  ;;  %v126_v33 = vpack.c.b8 %v125_v25, %v125_v25 }
  0x10   :  { %v124_v40 = vpack.c.b8 %v123_v29, %v123_v29  ;;  %v130_v41 = vpack.c.b8 %v129_v31, %v129_v31  ;;  %v138_v43 = vpack.c.b8 %v137_v34, %v137_v34  ;;  %v136_v44 = vpack.c.b8 %v135_v36, %v135_v36 }
  0x11   :  { %vm143_vm2 = vnez %v132_v20  ;;  %vm144_vm3 = vnez %v134_v30  ;;  %vm141_vm4 = vnez %v128_v32  ;;  %vm140_vm5 = vnez %v126_v33 }
  0x12   :  { %77 = vperm.xlu1 %341, %v38_v7   ;;  %72 = vperm.xlu0 %340, %v37_v8   ;;  %v151_v35 = vsel %vm143_vm2, 16843009, %v392_v2  ;;  %v152_v46 = vsel %vm144_vm3, 16843009, %v392_v2  ;;  %vm139_vm6 = vnez %v124_v40  ;;  %v149_v48 = vsel %vm141_vm4, 16843009, %v392_v2 }
  0x13   :  { %v159_v42 = vunpack.c.0.s8 %v151_v35  ;;  %vm142_vm7 = vnez %v130_v41  ;;  %v148_v49 = vsel %vm140_vm5, 16843009, %v392_v2  ;;  %vm146_vm9 = vnez %v138_v43 }
  0x14   :  { %282 = vperm.xlu2 %342, %v278_v9   ;;  %v160_v52 = vunpack.c.0.s8 %v152_v46  ;;  %v147_v54 = vsel %vm139_vm6, 16843009, %v392_v2  ;;  %vm145_vm10 = vnez %v136_v44  ;;  %v157_v56 = vunpack.c.0.s8 %v149_v48 }
  0x15   :  { %vm482_vm8 = vcmp.ne.s32.totalorder %v159_v42, 0  ;;  %v150_v58 = vsel %vm142_vm7, 16843009, %v392_v2  ;;  %v156_v60 = vunpack.c.0.s8 %v148_v49  ;;  %v154_v0 = vsel %vm146_vm9, 16843009, %v392_v2 }
  0x16   :  { %v155_v3 = vunpack.c.0.s8 %v147_v54  ;;  %v153_v4 = vsel %vm145_vm10, 16843009, %v392_v2  ;;  %v158_v6 = vunpack.c.0.s8 %v150_v58  ;;  %v162_v8 = vunpack.c.0.s8 %v154_v0 }
  0x17   :  { %vm164_vm0 = vcmp.ne.s32.totalorder %v156_v60, 0  ;;  %vm495_vm1 = vcmp.ne.s32.totalorder %v160_v52, 0  ;;  %v161_v14 = vunpack.c.0.s8 %v153_v4  ;;  %vm503_vm5 = vcmp.ne.s32.totalorder %v157_v56, 0 }
  0x18   :  { %vm163_vm4 = vcmp.ne.s32.totalorder %v155_v3, 0  ;;  %vm507_vm6 = vcmp.ne.s32.totalorder %v158_v6, 0  ;;  %vm511_vm7 = vcmp.ne.s32.totalorder %v162_v8, 0 }
  0x1a   :  { %287 = vperm.xlu0 %340, %v279_v10  }
  0x5e   :  { %v63_v27 = vpop.permute.xlu2 %62 }
  0x5f   :  { %v85_v45 = vadd.f32 %v476_v37, %v63_v27 }
  0x61   :  { %v101_v55 = vmul.f32 0.2, %v85_v45  ;;  %vm93_vm12 = vcmp.gt.f32.partialorder %v85_v45, 0.0 }
  0x63   :  { %v109_v9 = vsel %vm93_vm12, %v85_v45, %v101_v55 }
  0x64   :  { %v175_v17 = vsel %vm482_vm8, %v109_v9, -1e+30  ;;  %vm169_vm8 = vcmp.ne.s32.totalorder %v161_v14, 0 }
  0x65   :  { %v184_v32 = vsel %vm179_vm11, %v175_v17, -inf }
  0x66   :  { %v68_v47 = vpop.permute.xlu2 %67 }
  0x67   :  { %v86_v51 = vadd.f32 %v476_v37, %v68_v47 }
  0x69   :  { %v102_v1 = vmul.f32 0.2, %v86_v51  ;;  %vm94_vm14 = vcmp.gt.f32.partialorder %v86_v51, 0.0 }
  0x6b   :  { %v110_v2 = vsel %vm94_vm14, %v86_v51, %v102_v1 }
  0x6c   :  { %v176_v27 = vsel %vm495_vm1, %v110_v2, -1e+30 }
  0x6d   :  { %v186_v35 = vsel %vm179_vm11, %v176_v27, -inf }
  0x74   :  { %v53_v38 = vpop.permute.xlu1 %52  ;;  %v43_v39 = vpop.permute.xlu0 %42 }
  0x75   :  { %v81_v53 = vadd.f32 %v476_v37, %v43_v39  ;;  %v83_v61 = vadd.f32 %v476_v37, %v53_v38 }
  0x77   :  { %v97_v5 = vmul.f32 0.2, %v81_v53  ;;  %vm89_vm15 = vcmp.gt.f32.partialorder %v81_v53, 0.0  ;;  %v99_v10 = vmul.f32 0.2, %v83_v61  ;;  %vm91_vm2 = vcmp.gt.f32.partialorder %v83_v61, 0.0 }
  0x79   :  { %v105_v15 = vsel %vm89_vm15, %v81_v53, %v97_v5  ;;  %v107_v23 = vsel %vm91_vm2, %v83_v61, %v99_v10 }
  0x7a   :  { %v171_v28 = vsel %vm163_vm4, %v105_v15, -1e+30  ;;  %v173_v33 = vsel %vm503_vm5, %v107_v23, -1e+30 }
  0x7b   :  { %v180_v36 = vsel %vm179_vm11, %v171_v28, -inf  ;;  %v182_v42 = vsel %vm179_vm11, %v173_v33, -inf }
  0x7c   :  { %v58_v57 = vpop.permute.xlu1 %57  ;;  %v48_v59 = vpop.permute.xlu0 %47  ;;  %v185_v46 = vmax.f32 %v180_v36, %v184_v32 }
  0x7d   :  { %v84_v62 = vadd.f32 %v476_v37, %v58_v57  ;;  %v82_v63 = vadd.f32 %v476_v37, %v48_v59 }
  0x7f   :  { %vm90_vm13 = vcmp.gt.f32.partialorder %v82_v63, 0.0  ;;  %v98_v7 = vmul.f32 0.2, %v82_v63  ;;  %v100_v11 = vmul.f32 0.2, %v84_v62  ;;  %vm92_vm3 = vcmp.gt.f32.partialorder %v84_v62, 0.0 }
  0x81   :  { %v106_v12 = vsel %vm90_vm13, %v82_v63, %v98_v7  ;;  %v108_v24 = vsel %vm92_vm3, %v84_v62, %v100_v11 }
  0x82   :  { %v499_v16 = vsel %vm164_vm0, %v106_v12, -1e+30  ;;  %v174_v34 = vsel %vm507_vm6, %v108_v24, -1e+30 }
  0x83   :  { %v181_v29 = vsel %vm179_vm11, %v499_v16, -inf  ;;  %v183_v43 = vsel %vm179_vm11, %v174_v34, -inf }
  0x84   :  { %v78_v20 = vpop.permute.xlu1 %77  ;;  %v73_v22 = vpop.permute.xlu0 %72  ;;  %v187_v39 = vmax.f32 %v181_v29, %v186_v35 }
  0x85   :  { %v88_v25 = vadd.f32 %v476_v37, %v78_v20  ;;  %v87_v26 = vadd.f32 %v476_v37, %v73_v22 }
  0x86   :  { %v192_v49 = vmax.f32 %v185_v46, %v187_v39 }
  0x87   :  { %vm96_vm9 = vcmp.gt.f32.partialorder %v88_v25, 0.0  ;;  %v104_v30 = vmul.f32 0.2, %v88_v25  ;;  %vm95_vm10 = vcmp.gt.f32.partialorder %v87_v26, 0.0  ;;  %v103_v31 = vmul.f32 0.2, %v87_v26 }
  0x89   :  { %v112_v37 = vsel %vm96_vm9, %v88_v25, %v104_v30  ;;  %v111_v38 = vsel %vm95_vm10, %v87_v26, %v103_v31  ;;  %v335_v30 = vld [vmem:[%s559_s1] sm:$0xff] }
  0x8a   :  { %v178_v40 = vsel %vm511_vm7, %v112_v37, -1e+30  ;;  %v177_v41 = vsel %vm169_vm8, %v111_v38, -1e+30 }
  0x8b   :  { %v190_v44 = vsel %vm179_vm11, %v178_v40, -inf  ;;  %v188_v45 = vsel %vm179_vm11, %v177_v41, -inf }
  0x8c   :  { %v191_v47 = vmax.f32 %v183_v43, %v190_v44  ;;  %v189_v48 = vmax.f32 %v182_v42, %v188_v45 }
  0x8e   :  { %v193_v50 = vmax.f32 %v189_v48, %v191_v47  ;;  %v283_v48 = vpop.permute.xlu2 %282 }
  0x90   :  { %v194_v51 = vmax.f32 %v192_v49, %v193_v50 }
  0x92   :  { %v195_v52 = vrot.slane %v194_v51, 4 }
  0x94   :  { %v196_v53 = vmax.f32 %v194_v51, %v195_v52 }
  0x96   :  { %v197_v54 = vrot.slane %v196_v53, 2 }
  0x98   :  { %v198_v55 = vmax.f32 %v196_v53, %v197_v54  ;;  %v288_v54 = vpop.permute.xlu0 %287 }
  0x9a   :  { %v199_v56 = vrot.slane %v198_v55, 1 }
  0x9c   :  { %v200_v57 = vmax.f32 %v198_v55, %v199_v56 }
  0x9e   :  { %v207_v58 = vsub.f32 %v177_v41, %v200_v57  ;;  %v208_v59 = vsub.f32 %v178_v40, %v200_v57  ;;  %v205_v60 = vsub.f32 %v175_v17, %v200_v57  ;;  %v206_v61 = vsub.f32 %v176_v27, %v200_v57 }
  0x9f   :  { %v203_v62 = vsub.f32 %v173_v33, %v200_v57  ;;  %v204_v63 = vsub.f32 %v174_v34, %v200_v57  ;;  %v201_v4 = vsub.f32 %v171_v28, %v200_v57  ;;  %v202_v6 = vsub.f32 %v499_v16, %v200_v57 }
  0xa0   :  { %v221_v0 = vmul.f32 1.442695, %v207_v58  ;;  %v223_v1 = vmul.f32 1.442695, %v208_v59  ;;  %v217_v3 = vmul.f32 1.442695, %v205_v60 }
  0xa1   :  { %v219_v5 = vmul.f32 1.442695, %v206_v61  ;;  %v213_v7 = vmul.f32 1.442695, %v203_v62  ;;  %v215_v8 = vmul.f32 1.442695, %v204_v63 }
  0xa2   :  { %344 = vpow2.f32 %v221_v0  ;;  %v209_v9 = vmul.f32 1.442695, %v201_v4  ;;  %v211_v10 = vmul.f32 1.442695, %v202_v6  ;;  %v304_v60 = vld [vmem:[%s562_s4] sm:$0xff] }
  0xa3   :  { %346 = vpow2.f32 %v223_v1  ;;  %v305_v1 = vld [vmem:[%s562_s4 + $0x8] sm:$0xff] }
  0xa4   :  { %348 = vpow2.f32 %v217_v3 }
  0xa5   :  { %350 = vpow2.f32 %v219_v5 }
  0xa6   :  { %352 = vpow2.f32 %v213_v7 }
  0xa7   :  { %354 = vpow2.f32 %v215_v8 }
  0xa8   :  { %v345_v11 = vpop.eup %344  ;;  %356 = vpow2.f32 %v209_v9 }
  0xa9   :  { %v347_v12 = vpop.eup %346  ;;  %358 = vpow2.f32 %v211_v10  ;;  %v236_v34 = vsel %vm179_vm11, %v345_v11, 0.0 }
  0xaa   :  { %v349_v13 = vpop.eup %348  ;;  %v252_v14 = vpack.c.bf16 %v347_v12, %v345_v11  ;;  %v238_v36 = vsel %vm179_vm11, %v347_v12, 0.0 }
  0xab   :  { %v351_v2 = vpop.eup %350  ;;  %v232_v28 = vsel %vm179_vm11, %v349_v13, 0.0 }
  0xac   :  { %v353_v15 = vpop.eup %352  ;;  %265 = vmatpush.bf16.msra.mxu0 %v252_v14  ;;  %v251_v18 = vpack.c.bf16 %v351_v2, %v349_v13  ;;  %v234_v32 = vsel %vm179_vm11, %v351_v2, 0.0 }
  0xad   :  { %v355_v16 = vpop.eup %354  ;;  %v228_v23 = vsel %vm179_vm11, %v353_v15, 0.0 }
  0xae   :  { %v357_v17 = vpop.eup %356  ;;  %v250_v24 = vpack.c.bf16 %v355_v16, %v353_v15  ;;  %v230_v26 = vsel %vm179_vm11, %v355_v16, 0.0 }
  0xaf   :  { %v359_v19 = vpop.eup %358  ;;  %v225_v20 = vsel %vm179_vm11, %v357_v17, 0.0 }
  0xb0   :  { %266 = vmatpush.bf16.msra.mxu0 %v251_v18  ;;  %v226_v21 = vsel %vm179_vm11, %v359_v19, 0.0  ;;  %v249_v29 = vpack.c.bf16 %v359_v19, %v357_v17 }
  0xb1   :  { %v227_v22 = vadd.f32 %v226_v21, %v225_v20 }
  0xb3   :  { %v229_v25 = vadd.f32 %v228_v23, %v227_v22 }
  0xb4   :  { %267 = vmatpush.bf16.msra.mxu0 %v250_v24 }
  0xb5   :  { %v231_v27 = vadd.f32 %v230_v26, %v229_v25 }
  0xb7   :  { %v233_v31 = vadd.f32 %v232_v28, %v231_v27 }
  0xb8   :  { %268 = vmatpush.bf16.msra.mxu0 %v249_v29 }
  0xb9   :  { %v235_v33 = vadd.f32 %v234_v32, %v233_v31 }
  0xbb   :  { %332 = vmatmul.msk.bf16.vlgmr.msra.gmra.mxu0 %vm179_vm11, %v335_v30  ;;  %v237_v35 = vadd.f32 %v236_v34, %v235_v33 }
  0xbd   :  { %v239_v37 = vadd.f32 %v238_v36, %v237_v35 }
  0xbf   :  { %v240_v38 = vrot.slane %v239_v37, 4 }
  0xc1   :  { %v241_v39 = vadd.f32 %v240_v38, %v239_v37 }
  0xc3   :  { %v242_v40 = vrot.slane %v241_v39, 2 }
  0xc5   :  { %v243_v41 = vadd.f32 %v242_v40, %v241_v39 }
  0xc7   :  { %v244_v42 = vrot.slane %v243_v41, 1 }
  0xc9   :  { %v245_v43 = vadd.f32 %v244_v42, %v243_v41 }
  0xcb   :  { %v246_v44 = vmax.f32 %v245_v43, 1e-09 }
  0xcd   :  { %360 = vrcp.f32 %v246_v44 }
  0xd3   :  { %v361_v45 = vpop.eup %360 }
 0x138   :  { %v270_v46 = vpop.f32.mrf.mxu0 }
 0x139   :  { %v276_v47 = vmul.f32 %v361_v45, %v270_v46 }
 0x13b   :  { %v290_v49 = vadd.f32 %v283_v48, %v276_v47 }
 0x13d   :  { %v294_v50 = vmin.f32 %v290_v49, 0.0  ;;  %vm292_vm12 = vcmp.gt.f32.partialorder %v290_v49, 0.0 }
 0x13f   :  { %v296_v51 = vmul.f32 1.442695, %v294_v50 }
 0x140   :  { %v272_v52 = vpop.f32.mrf.mxu0 }
 0x141   :  { %362 = vpow2.f32 %v296_v51  ;;  %v277_v53 = vmul.f32 %v361_v45, %v272_v52 }
 0x143   :  { %v291_v55 = vadd.f32 %v288_v54, %v277_v53 }
 0x145   :  { %v295_v56 = vmin.f32 %v291_v55, 0.0  ;;  %vm293_vm13 = vcmp.gt.f32.partialorder %v291_v55, 0.0 }
 0x147   :  { %v363_v57 = vpop.eup %362  ;;  %v298_v58 = vmul.f32 1.442695, %v295_v56 }
 0x148   :  { %v333_v59 = vadd.f32 -1.0, %v363_v57 }
 0x149   :  { %364 = vpow2.f32 %v298_v58 }
 0x14a   :  { %v302_v61 = vsel %vm292_vm12, %v290_v49, %v333_v59 }
 0x14b   :  { %v306_v62 = vadd.f32 %v304_v60, %v302_v61 }
 0x14d   :  { %308 = vst.msk [vmem:[#allocation2] sm:$0xff] %vm179_vm11, %v306_v62 }
 0x14f   :  { %v365_v63 = vpop.eup %364 }
 0x150   :  { %v334_v0 = vadd.f32 -1.0, %v365_v63 }
 0x152   :  { %v303_v3 = vsel %vm293_vm13, %v291_v55, %v334_v0 }
 0x153   :  { %v307_v4 = vadd.f32 %v305_v1, %v303_v3 }
 0x155   :  { %309 = vst.msk [vmem:[#allocation2 + $0x8] sm:$0xff] %vm179_vm11, %v307_v4 }
 0x156   :  { %322 = dma.vmem_to_hbm [thread:$0]  %s315_s23, 256, %s317_s26, [#allocation3], %s394_s29, %s394_s29, %s395_s30  }
 0x157   :  { %390 = dma.done.wait [#allocation3], 256  }
 0x158   :  { %391 = vsyncadd [#allocation3], 4294967040 }
 0x159   :  { %327 = vsyncpa [#allocation3], 1 }

</bundles_post_ra>
